<compile_context>
chip_gen: v7x
topology: tpu7x:2x2x1
jax: 0.10.0
libtpu: 0.0.40
codegen_flags: <defaults>
</compile_context>

<pallas_src>
import jax
import jax.numpy as jnp
import numpy as np
from jax import lax
from jax.experimental import pallas as pl
from jax.experimental.pallas import tpu as pltpu

EMBED = 300        # title/text embedding size
HID = 50           # LSTM hidden size
MLP_HID = 100      # linear1 hidden size
N_BIAS = 5         # bias_out classes

HID_PAD = 64       # lane-padded hidden (64 lanes per gate)
GATES = 4 * HID_PAD    # 256: fused i|f|g|o, each in its own 64-lane block
MLP_PAD = 128      # lane-padded MLP hidden

# Set to jnp.bfloat16 on v6e/v7x for ~2-3x on the hoisted input projection
# (f32 accumulation is kept); requires relaxing the self-test tolerance.
PROJ_DTYPE = jnp.float32

_VMEM = pl.BlockSpec(memory_space=pltpu.MemorySpace.VMEM)
_SMEM = pl.BlockSpec(memory_space=pltpu.MemorySpace.SMEM)


# ---------------------------------------------------------------------------
# Fused Pallas kernel: title LSTM + text LSTM + MLP head (one launch)
# ---------------------------------------------------------------------------
def _bilstm_head_kernel(nsteps_ref,                 # SMEM (1,) i32: max(len) over both streams
                        lens_t_ref, lens_x_ref,     # VMEM (Bp,1) i32
                        xt_ref, xx_ref,             # VMEM (Tt*Bp,E), (Tx*Bp,E) (time-major rows)
                        wih_t_ref, whh_t_ref, b_t_ref,
                        wih_x_ref, whh_x_ref, b_x_ref,
                        w1_ref, b1_ref, wb_ref, bb_ref, wh_ref, bh_ref,
                        logp_ref, hyp_ref,
                        xg_t_scr, xg_x_scr):
    B = lens_t_ref.shape[0]                 # padded batch (multiple of 8)
    Tt = xg_t_scr.shape[0] // B
    Tx = xg_x_scr.shape[0] // B

    # Hoisted input projections: one large MXU matmul per stream over all
    # timesteps -> VMEM scratch (T*B, GATES), f32 accumulate.
    xg_t_scr[...] = jnp.dot(xt_ref[...], wih_t_ref[...],
                            preferred_element_type=jnp.float32)
    xg_x_scr[...] = jnp.dot(xx_ref[...], wih_x_ref[...],
                            preferred_element_type=jnp.float32)

    # Hoisted loop-invariant loads (lens, biases, recurrent weights).
    lens_t = lens_t_ref[...]                # (B,1) i32
    lens_x = lens_x_ref[...]
    b_t = b_t_ref[...]                      # (1, GATES)
    b_x = b_x_ref[...]
    whh_t = whh_t_ref[...]                  # (HID_PAD, GATES) = 64 KB f32
    whh_x = whh_x_ref[...]

    nsteps = nsteps_ref[0]

    def cell(z, c):
        # Gate blocks at 64-lane offsets (order i, f, g, o).
        i_g = jax.nn.sigmoid(z[:, 0 * HID_PAD:1 * HID_PAD])
        f_g = jax.nn.sigmoid(z[:, 1 * HID_PAD:2 * HID_PAD])
        g_g = jnp.tanh(z[:, 2 * HID_PAD:3 * HID_PAD])
        o_g = jax.nn.sigmoid(z[:, 3 * HID_PAD:4 * HID_PAD])
        c_new = f_g * c + i_g * g_g
        h_new = o_g * jnp.tanh(c_new)
        return h_new, c_new

    def step(t, carry):
        h_t, c_t, h_x, c_x = carry
        # Clamp row index so the shared loop (to max of both streams) never
        # reads past either slab; the length mask freezes those rows anyway.
        row_t = pl.multiple_of(jnp.minimum(t, Tt - 1) * B, B)
        row_x = pl.multiple_of(jnp.minimum(t, Tx - 1) * B, B)

        # One recurrent matmul per stream per step: (B,64) @ (64,256).
        z_t = (xg_t_scr[pl.ds(row_t, B), :]
               + jnp.dot(h_t, whh_t, preferred_element_type=jnp.float32) + b_t)
        z_x = (xg_x_scr[pl.ds(row_x, B), :]
               + jnp.dot(h_x, whh_x, preferred_element_type=jnp.float32) + b_x)

        hn_t, cn_t = cell(z_t, c_t)
        hn_x, cn_x = cell(z_x, c_x)

        # pack_padded_sequence semantics: freeze state past each row's length.
        v_t = t < lens_t                    # (B,1) broadcasts over lanes
        v_x = t < lens_x
        h_t = jnp.where(v_t, hn_t, h_t)
        c_t = jnp.where(v_t, cn_t, c_t)
        h_x = jnp.where(v_x, hn_x, h_x)
        c_x = jnp.where(v_x, cn_x, c_x)
        return (h_t, c_t, h_x, c_x)

    zeros = jnp.zeros((B, HID_PAD), jnp.float32)
    h_t, c_t, h_x, c_x = lax.fori_loop(0, nsteps, step,
                                       (zeros, zeros, zeros, zeros))

    # Head: F.relu(h_n[0]) for both streams, cat -> (B, 128) = one lane tile;
    # the two K=50 matmuls of linear1 are folded into one (B,128)@(128,128).
    ht = jnp.maximum(h_t, 0.0)
    hx = jnp.maximum(h_x, 0.0)
    cat = jnp.concatenate([ht, hx], axis=1)          # (B, 128)
    x = jnp.maximum(
        jnp.dot(cat, w1_ref[...], preferred_element_type=jnp.float32) + b1_ref[...],
        0.0)

    # log_softmax over 5 classes
    logits = jnp.dot(x, wb_ref[...], preferred_element_type=jnp.float32) + bb_ref[...]
    m = jnp.max(logits, axis=1, keepdims=True)
    lse = jnp.log(jnp.sum(jnp.exp(logits - m), axis=1, keepdims=True)) + m
    logp_ref[...] = logits - lse

    # sigmoid hyperpartisan head
    hyp = jnp.dot(x, wh_ref[...], preferred_element_type=jnp.float32) + bh_ref[...]
    hyp_ref[...] = jax.nn.sigmoid(hyp)


# ---------------------------------------------------------------------------
# Parameters: canonical (PyTorch-layout) init + kernel-layout packing
# ---------------------------------------------------------------------------
def init_params(key, title_size, text_size):
    ks = jax.random.split(key, 16)

    def u(k, shape, bound):
        return jax.random.uniform(k, shape, jnp.float32, -bound, bound)

    p = {}
    p["title_emb"] = jax.random.normal(ks[0], (title_size, EMBED), jnp.float32)
    p["text_emb"] = jax.random.normal(ks[1], (text_size, EMBED), jnp.float32)

    kH = 1.0 / np.sqrt(HID)
    for name, k0 in (("title", 2), ("text", 6)):
        p[name + "_w_ih"] = u(ks[k0], (4 * HID, EMBED), kH)    # PyTorch (4H, E)
        p[name + "_w_hh"] = u(ks[k0 + 1], (4 * HID, HID), kH)  # PyTorch (4H, H)
        p[name + "_b_ih"] = u(ks[k0 + 2], (4 * HID,), kH)
        p[name + "_b_hh"] = u(ks[k0 + 3], (4 * HID,), kH)

    k1 = 1.0 / np.sqrt(2 * HID)
    p["w1"] = u(ks[10], (MLP_HID, 2 * HID), k1)               # (out, in)
    p["b1"] = u(ks[11], (MLP_HID,), k1)

    k2 = 1.0 / np.sqrt(MLP_HID)
    p["wb"] = u(ks[12], (N_BIAS, MLP_HID), k2)
    p["bb"] = u(ks[13], (N_BIAS,), k2)
    p["wh"] = u(ks[14], (1, MLP_HID), k2)
    p["bh"] = u(ks[15], (1,), k2)
    return p


def _pack_lstm(w_ih, w_hh, b_ih, b_hh):
    """Fuse the 4 gates into lane-padded (E,256) / (64,256) / (1,256)."""
    E = w_ih.shape[1]
    wih = jnp.zeros((E, GATES), jnp.float32)
    whh = jnp.zeros((HID_PAD, GATES), jnp.float32)
    b = jnp.zeros((1, GATES), jnp.float32)
    for g in range(4):                       # PyTorch gate order i, f, g, o
        src = slice(g * HID, (g + 1) * HID)
        dst = slice(g * HID_PAD, g * HID_PAD + HID)
        wih = wih.at[:, dst].set(w_ih[src, :].T)
        whh = whh.at[:HID, dst].set(w_hh[src, :].T)
        b = b.at[0, dst].set(b_ih[src] + b_hh[src])
    return wih, whh, b


def pack_params(p):
    kp = {"title_emb": p["title_emb"], "text_emb": p["text_emb"]}
    for name in ("title", "text"):
        wih, whh, b = _pack_lstm(p[f"{name}_w_ih"], p[f"{name}_w_hh"],
                                 p[f"{name}_b_ih"], p[f"{name}_b_hh"])
        kp[f"{name}_wih"] = wih.astype(PROJ_DTYPE)
        kp[f"{name}_whh"] = whh
        kp[f"{name}_b"] = b

    # linear1: rows 0:50 of w1.T act on ht, rows 50:100 on hx; place them at
    # the lane-padded offsets 0 and 64 so cat(ht, hx) multiplies directly.
    w1t = p["w1"].T                                           # (2H, MLP_HID)
    w1 = jnp.zeros((2 * HID_PAD, MLP_PAD), jnp.float32)
    w1 = w1.at[:HID, :MLP_HID].set(w1t[:HID])
    w1 = w1.at[HID_PAD:HID_PAD + HID, :MLP_HID].set(w1t[HID:])
    kp["w1"] = w1
    kp["b1"] = jnp.zeros((1, MLP_PAD), jnp.float32).at[0, :MLP_HID].set(p["b1"])

    kp["wb"] = jnp.zeros((MLP_PAD, N_BIAS), jnp.float32).at[:MLP_HID].set(p["wb"].T)
    kp["bb"] = p["bb"].reshape(1, N_BIAS)
    kp["wh"] = jnp.zeros((MLP_PAD, 1), jnp.float32).at[:MLP_HID].set(p["wh"].T)
    kp["bh"] = p["bh"].reshape(1, 1)
    return kp


def _vmem_limit_bytes(Tt, Tx, Bp):
    """Explicit scoped-VMEM budget (v5e default is only 16 MiB)."""
    f32 = 4
    proj = np.dtype(PROJ_DTYPE).itemsize
    x_bytes = (Tt + Tx) * Bp * EMBED * proj                   # x slabs
    xg_bytes = (Tt + Tx) * Bp * GATES * f32                   # xg scratch slabs
    w_bytes = (2 * (EMBED * GATES * proj + HID_PAD * GATES * f32 + GATES * f32)
               + (2 * HID_PAD * MLP_PAD + MLP_PAD
                  + MLP_PAD * (N_BIAS + 1) + N_BIAS + 1 + MLP_PAD) * f32)
    io_bytes = Bp * (N_BIAS + 1 + 2) * f32
    est = x_bytes + xg_bytes + w_bytes + io_bytes
    return int(min(100 * 2**20, max(32 * 2**20, 2 * est)))


# ---------------------------------------------------------------------------
# Forward (glue in plain JAX, hot path in one fused Pallas kernel)
# ---------------------------------------------------------------------------
def bilstm_forward(kp, x_titles, title_lengths, x_texts, text_lengths):
    B, Tt = x_titles.shape
    Tx = x_texts.shape[1]
    Bp = max(8, ((B + 7) // 8) * 8)          # pad batch to sublane multiple
    pad = Bp - B

    t_ids = jnp.pad(x_titles, ((0, pad), (0, 0)))
    x_ids = jnp.pad(x_texts, ((0, pad), (0, 0)))
    t_len = jnp.pad(title_lengths.astype(jnp.int32), (0, pad)).reshape(Bp, 1)
    x_len = jnp.pad(text_lengths.astype(jnp.int32), (0, pad)).reshape(Bp, 1)

    # Embedding lookup (frozen table) + eval-mode dropout (identity): plain JAX.
    t_emb = jnp.take(kp["title_emb"], t_ids, axis=0)          # (Bp,Tt,E)
    x_emb = jnp.take(kp["text_emb"], x_ids, axis=0)           # (Bp,Tx,E)

    # Time-major and flattened to (T*Bp, E) rows so the kernel's hoisted input
    # projection is one large matmul; row index = t*Bp + b.
    t_flat = jnp.transpose(t_emb, (1, 0, 2)).reshape(Tt * Bp, EMBED).astype(PROJ_DTYPE)
    x_flat = jnp.transpose(x_emb, (1, 0, 2)).reshape(Tx * Bp, EMBED).astype(PROJ_DTYPE)

    # Shared trip count for the interleaved recurrence (max over both streams).
    nsteps = jnp.maximum(jnp.max(t_len), jnp.max(x_len)).reshape(1).astype(jnp.int32)

    logp, hyp = pl.pallas_call(
        _bilstm_head_kernel,
        out_shape=(jax.ShapeDtypeStruct((Bp, N_BIAS), jnp.float32),
                   jax.ShapeDtypeStruct((Bp, 1), jnp.float32)),
        in_specs=[_SMEM] + [_VMEM] * 16,
        out_specs=(_VMEM, _VMEM),
        scratch_shapes=[
            pltpu.VMEM((Tt * Bp, GATES), jnp.float32),   # title x@W_ih slab
            pltpu.VMEM((Tx * Bp, GATES), jnp.float32),   # text  x@W_ih slab
        ],
        compiler_params=pltpu.CompilerParams(
            vmem_limit_bytes=_vmem_limit_bytes(Tt, Tx, Bp)),
    )(nsteps, t_len, x_len, t_flat, x_flat,
      kp["title_wih"], kp["title_whh"], kp["title_b"],
      kp["text_wih"], kp["text_whh"], kp["text_b"],
      kp["w1"], kp["b1"], kp["wb"], kp["bb"], kp["wh"], kp["bh"])

    return logp[:B], hyp[:B]


# ---------------------------------------------------------------------------
# Pure-JAX reference (same math, canonical PyTorch-layout params)
# ---------------------------------------------------------------------------
def reference_forward(params, x_titles, title_lengths, x_texts, text_lengths):
    def lstm_ref(emb, lengths, w_ih, w_hh, b_ih, b_hh):
        B, T, _ = emb.shape
        H = w_hh.shape[1]
        h = jnp.zeros((B, H), jnp.float32)
        c = jnp.zeros((B, H), jnp.float32)
        b = b_ih + b_hh
        for t in range(T):
            g = emb[:, t, :] @ w_ih.T + h @ w_hh.T + b
            i = jax.nn.sigmoid(g[:, 0:H])
            f = jax.nn.sigmoid(g[:, H:2 * H])
            gg = jnp.tanh(g[:, 2 * H:3 * H])
            o = jax.nn.sigmoid(g[:, 3 * H:4 * H])
            c_new = f * c + i * gg
            h_new = o * jnp.tanh(c_new)
            valid = (t < lengths)[:, None]
            h = jnp.where(valid, h_new, h)
            c = jnp.where(valid, c_new, c)
        return jnp.maximum(h, 0.0)

    t_emb = jnp.take(params["title_emb"], x_titles, axis=0).astype(jnp.float32)
    x_emb = jnp.take(params["text_emb"], x_texts, axis=0).astype(jnp.float32)
    ht = lstm_ref(t_emb, title_lengths, params["title_w_ih"], params["title_w_hh"],
                  params["title_b_ih"], params["title_b_hh"])
    hx = lstm_ref(x_emb, text_lengths, params["text_w_ih"], params["text_w_hh"],
                  params["text_b_ih"], params["text_b_hh"])
    z = jnp.maximum(jnp.concatenate([ht, hx], axis=1) @ params["w1"].T + params["b1"], 0.0)
    logits = z @ params["wb"].T + params["bb"]
    logp = logits - jax.scipy.special.logsumexp(logits, axis=1, keepdims=True)
    hyp = jax.nn.sigmoid(z @ params["wh"].T + params["bh"])
    return logp, hyp


# ---------------------------------------------------------------------------
if __name__ == "__main__":
    key = jax.random.PRNGKey(0)
    k_par, k_t, k_x = jax.random.split(key, 3)

    B = 2
    TITLE_VOCAB, TEXT_VOCAB = 100, 150
    T_TITLE, T_TEXT = 8, 12

    params = init_params(k_par, TITLE_VOCAB, TEXT_VOCAB)
    kparams = pack_params(params)

    x_titles = jax.random.randint(k_t, (B, T_TITLE), 0, TITLE_VOCAB, dtype=jnp.int32)
    x_texts = jax.random.randint(k_x, (B, T_TEXT), 0, TEXT_VOCAB, dtype=jnp.int32)
    title_lengths = jnp.array([8, 5], dtype=jnp.int32)
    text_lengths = jnp.array([12, 7], dtype=jnp.int32)

    logp, hyp = bilstm_forward(kparams, x_titles, title_lengths, x_texts, text_lengths)
    logp = jax.block_until_ready(logp)
    hyp = jax.block_until_ready(hyp)

    ref_logp, ref_hyp = reference_forward(params, x_titles, title_lengths,
                                          x_texts, text_lengths)
    assert logp.shape == (B, N_BIAS) and hyp.shape == (B, 1)
    tol = 2e-4 if PROJ_DTYPE == jnp.float32 else 5e-2
    np.testing.assert_allclose(np.asarray(logp), np.asarray(ref_logp), atol=tol, rtol=tol)
    np.testing.assert_allclose(np.asarray(hyp), np.asarray(ref_hyp), atol=tol, rtol=tol)

    print("KERNEL_OK")
</pallas_src>

<mosaic_0001>
module attributes {stable_mosaic.version = 11 : i64} {
  func.func @_bilstm_head_kernel(%arg0: memref<1xi32, #tpu.memory_space<smem>>, %arg1: memref<8x1xi32, #tpu.memory_space<vmem>>, %arg2: memref<8x1xi32, #tpu.memory_space<vmem>>, %arg3: memref<64x300xf32, #tpu.memory_space<vmem>>, %arg4: memref<96x300xf32, #tpu.memory_space<vmem>>, %arg5: memref<300x256xf32, #tpu.memory_space<vmem>>, %arg6: memref<64x256xf32, #tpu.memory_space<vmem>>, %arg7: memref<1x256xf32, #tpu.memory_space<vmem>>, %arg8: memref<300x256xf32, #tpu.memory_space<vmem>>, %arg9: memref<64x256xf32, #tpu.memory_space<vmem>>, %arg10: memref<1x256xf32, #tpu.memory_space<vmem>>, %arg11: memref<128x128xf32, #tpu.memory_space<vmem>>, %arg12: memref<1x128xf32, #tpu.memory_space<vmem>>, %arg13: memref<128x5xf32, #tpu.memory_space<vmem>>, %arg14: memref<1x5xf32, #tpu.memory_space<vmem>>, %arg15: memref<128x1xf32, #tpu.memory_space<vmem>>, %arg16: memref<1x1xf32, #tpu.memory_space<vmem>>, %arg17: memref<8x5xf32, #tpu.memory_space<vmem>>, %arg18: memref<8x1xf32, #tpu.memory_space<vmem>>, %arg19: memref<64x256xf32, #tpu.memory_space<vmem>>, %arg20: memref<96x256xf32, #tpu.memory_space<vmem>>) attributes {dimension_semantics = [], scalar_prefetch = 0 : i64, scratch_operands = 2 : i64, tpu.core_type = #tpu.core_type<tc>} {
    %c0 = arith.constant 0 : index
    %c0_0 = arith.constant 0 : index
    %0 = vector.load %arg3[%c0, %c0_0] : memref<64x300xf32, #tpu.memory_space<vmem>>, vector<64x300xf32>
    %c0_1 = arith.constant 0 : index
    %c0_2 = arith.constant 0 : index
    %1 = vector.load %arg5[%c0_1, %c0_2] : memref<300x256xf32, #tpu.memory_space<vmem>>, vector<300x256xf32>
    %cst = arith.constant dense<0.000000e+00> : vector<64x256xf32>
    %2 = tpu.matmul %0, %1, %cst {dimension_numbers = #tpu.dot_dimension_numbers<[1], [0], [0], [1], [0, 0, 1, 1], [], []>} : vector<64x300xf32>, vector<300x256xf32>, vector<64x256xf32> -> vector<64x256xf32>
    %c0_3 = arith.constant 0 : index
    %c0_4 = arith.constant 0 : index
    %3 = vector.load %arg19[%c0_3, %c0_4] : memref<64x256xf32, #tpu.memory_space<vmem>>, vector<64x256xf32>
    tpu.vector_store %arg19[%c0_3, %c0_4], %2 {strides = array<i32>} : memref<64x256xf32, #tpu.memory_space<vmem>>, vector<64x256xf32>,
    %c0_5 = arith.constant 0 : index
    %c0_6 = arith.constant 0 : index
    %4 = vector.load %arg4[%c0_5, %c0_6] : memref<96x300xf32, #tpu.memory_space<vmem>>, vector<96x300xf32>
    %c0_7 = arith.constant 0 : index
    %c0_8 = arith.constant 0 : index
    %5 = vector.load %arg8[%c0_7, %c0_8] : memref<300x256xf32, #tpu.memory_space<vmem>>, vector<300x256xf32>
    %cst_9 = arith.constant dense<0.000000e+00> : vector<96x256xf32>
    %6 = tpu.matmul %4, %5, %cst_9 {dimension_numbers = #tpu.dot_dimension_numbers<[1], [0], [0], [1], [0, 0, 1, 1], [], []>} : vector<96x300xf32>, vector<300x256xf32>, vector<96x256xf32> -> vector<96x256xf32>
    %c0_10 = arith.constant 0 : index
    %c0_11 = arith.constant 0 : index
    %7 = vector.load %arg20[%c0_10, %c0_11] : memref<96x256xf32, #tpu.memory_space<vmem>>, vector<96x256xf32>
    tpu.vector_store %arg20[%c0_10, %c0_11], %6 {strides = array<i32>} : memref<96x256xf32, #tpu.memory_space<vmem>>, vector<96x256xf32>,
    %c0_12 = arith.constant 0 : index
    %c0_13 = arith.constant 0 : index
    %8 = vector.load %arg1[%c0_12, %c0_13] : memref<8x1xi32, #tpu.memory_space<vmem>>, vector<8x1xi32>
    %c0_14 = arith.constant 0 : index
    %c0_15 = arith.constant 0 : index
    %9 = vector.load %arg2[%c0_14, %c0_15] : memref<8x1xi32, #tpu.memory_space<vmem>>, vector<8x1xi32>
    %c0_16 = arith.constant 0 : index
    %c0_17 = arith.constant 0 : index
    %10 = vector.load %arg7[%c0_16, %c0_17] : memref<1x256xf32, #tpu.memory_space<vmem>>, vector<1x256xf32>
    %c0_18 = arith.constant 0 : index
    %c0_19 = arith.constant 0 : index
    %11 = vector.load %arg10[%c0_18, %c0_19] : memref<1x256xf32, #tpu.memory_space<vmem>>, vector<1x256xf32>
    %c0_20 = arith.constant 0 : index
    %c0_21 = arith.constant 0 : index
    %12 = vector.load %arg6[%c0_20, %c0_21] : memref<64x256xf32, #tpu.memory_space<vmem>>, vector<64x256xf32>
    %c0_22 = arith.constant 0 : index
    %c0_23 = arith.constant 0 : index
    %13 = vector.load %arg9[%c0_22, %c0_23] : memref<64x256xf32, #tpu.memory_space<vmem>>, vector<64x256xf32>
    %c0_24 = arith.constant 0 : index
    %14 = memref.load %arg0[%c0_24] : memref<1xi32, #tpu.memory_space<smem>>
    %cst_25 = arith.constant 0.000000e+00 : f32
    %15 = vector.broadcast %cst_25 : f32 to vector<8x64xf32>
    %c0_i32 = arith.constant 0 : i32
    %16 = arith.subi %14, %c0_i32 : i32
    %17 = arith.addi %c0_i32, %16 : i32
    %c1_i32 = arith.constant 1 : i32
    %18:4 = scf.for %arg21 = %c0_i32 to %17 step %c1_i32 iter_args(%arg22 = %15, %arg23 = %15, %arg24 = %15, %arg25 = %15) -> (vector<8x64xf32>, vector<8x64xf32>, vector<8x64xf32>, vector<8x64xf32>)  : i32 {
      %c7_i32 = arith.constant 7 : i32
      %59 = arith.minsi %arg21, %c7_i32 : i32
      %c8_i32 = arith.constant 8 : i32
      %60 = arith.muli %59, %c8_i32 : i32
      %61 = tpu.assume_multiple %60, 8 : i32
      %c11_i32 = arith.constant 11 : i32
      %62 = arith.minsi %arg21, %c11_i32 : i32
      %c8_i32_51 = arith.constant 8 : i32
      %63 = arith.muli %62, %c8_i32_51 : i32
      %64 = tpu.assume_multiple %63, 8 : i32
      %65 = arith.index_cast %61 : i32 to index
      %c0_52 = arith.constant 0 : index
      %66 = vector.load %arg19[%65, %c0_52] : memref<64x256xf32, #tpu.memory_space<vmem>>, vector<8x256xf32>
      %cst_53 = arith.constant dense<0.000000e+00> : vector<8x256xf32>
      %67 = tpu.matmul %arg22, %12, %cst_53 {dimension_numbers = #tpu.dot_dimension_numbers<[1], [0], [0], [1], [0, 0, 1, 1], [], []>} : vector<8x64xf32>, vector<64x256xf32>, vector<8x256xf32> -> vector<8x256xf32>
      %68 = arith.addf %66, %67 : vector<8x256xf32>
      %69 = vector.broadcast %10 : vector<1x256xf32> to vector<8x256xf32>
      %70 = arith.addf %68, %69 : vector<8x256xf32>
      %71 = arith.index_cast %64 : i32 to index
      %c0_54 = arith.constant 0 : index
      %72 = vector.load %arg20[%71, %c0_54] : memref<96x256xf32, #tpu.memory_space<vmem>>, vector<8x256xf32>
      %cst_55 = arith.constant dense<0.000000e+00> : vector<8x256xf32>
      %73 = tpu.matmul %arg24, %13, %cst_55 {dimension_numbers = #tpu.dot_dimension_numbers<[1], [0], [0], [1], [0, 0, 1, 1], [], []>} : vector<8x64xf32>, vector<64x256xf32>, vector<8x256xf32> -> vector<8x256xf32>
      %74 = arith.addf %72, %73 : vector<8x256xf32>
      %75 = vector.broadcast %11 : vector<1x256xf32> to vector<8x256xf32>
      %76 = arith.addf %74, %75 : vector<8x256xf32>
      %77 = vector.extract_strided_slice %70 {offsets = [0, 0], sizes = [8, 64], strides = [1, 1]} : vector<8x256xf32> to vector<8x64xf32>
      %78 = arith.negf %77 : vector<8x64xf32>
      %79 = math.exp %78 : vector<8x64xf32>
      %cst_56 = arith.constant 1.000000e+00 : f32
      %80 = vector.broadcast %cst_56 : f32 to vector<8x64xf32>
      %81 = arith.addf %80, %79 : vector<8x64xf32>
      %82 = arith.divf %80, %81 : vector<8x64xf32>
      %83 = vector.extract_strided_slice %70 {offsets = [0, 64], sizes = [8, 64], strides = [1, 1]} : vector<8x256xf32> to vector<8x64xf32>
      %84 = arith.negf %83 : vector<8x64xf32>
      %85 = math.exp %84 : vector<8x64xf32>
      %cst_57 = arith.constant 1.000000e+00 : f32
      %86 = vector.broadcast %cst_57 : f32 to vector<8x64xf32>
      %87 = arith.addf %86, %85 : vector<8x64xf32>
      %88 = arith.divf %86, %87 : vector<8x64xf32>
      %89 = vector.extract_strided_slice %70 {offsets = [0, 128], sizes = [8, 64], strides = [1, 1]} : vector<8x256xf32> to vector<8x64xf32>
      %90 = math.tanh %89 : vector<8x64xf32>
      %91 = vector.extract_strided_slice %70 {offsets = [0, 192], sizes = [8, 64], strides = [1, 1]} : vector<8x256xf32> to vector<8x64xf32>
      %92 = arith.negf %91 : vector<8x64xf32>
      %93 = math.exp %92 : vector<8x64xf32>
      %cst_58 = arith.constant 1.000000e+00 : f32
      %94 = vector.broadcast %cst_58 : f32 to vector<8x64xf32>
      %95 = arith.addf %94, %93 : vector<8x64xf32>
      %96 = arith.divf %94, %95 : vector<8x64xf32>
      %97 = arith.mulf %88, %arg23 : vector<8x64xf32>
      %98 = arith.mulf %82, %90 : vector<8x64xf32>
      %99 = arith.addf %97, %98 : vector<8x64xf32>
      %100 = math.tanh %99 : vector<8x64xf32>
      %101 = arith.mulf %96, %100 : vector<8x64xf32>
      %102 = vector.extract_strided_slice %76 {offsets = [0, 0], sizes = [8, 64], strides = [1, 1]} : vector<8x256xf32> to vector<8x64xf32>
      %103 = arith.negf %102 : vector<8x64xf32>
      %104 = math.exp %103 : vector<8x64xf32>
      %cst_59 = arith.constant 1.000000e+00 : f32
      %105 = vector.broadcast %cst_59 : f32 to vector<8x64xf32>
      %106 = arith.addf %105, %104 : vector<8x64xf32>
      %107 = arith.divf %105, %106 : vector<8x64xf32>
      %108 = vector.extract_strided_slice %76 {offsets = [0, 64], sizes = [8, 64], strides = [1, 1]} : vector<8x256xf32> to vector<8x64xf32>
      %109 = arith.negf %108 : vector<8x64xf32>
      %110 = math.exp %109 : vector<8x64xf32>
      %cst_60 = arith.constant 1.000000e+00 : f32
      %111 = vector.broadcast %cst_60 : f32 to vector<8x64xf32>
      %112 = arith.addf %111, %110 : vector<8x64xf32>
      %113 = arith.divf %111, %112 : vector<8x64xf32>
      %114 = vector.extract_strided_slice %76 {offsets = [0, 128], sizes = [8, 64], strides = [1, 1]} : vector<8x256xf32> to vector<8x64xf32>
      %115 = math.tanh %114 : vector<8x64xf32>
      %116 = vector.extract_strided_slice %76 {offsets = [0, 192], sizes = [8, 64], strides = [1, 1]} : vector<8x256xf32> to vector<8x64xf32>
      %117 = arith.negf %116 : vector<8x64xf32>
      %118 = math.exp %117 : vector<8x64xf32>
      %cst_61 = arith.constant 1.000000e+00 : f32
      %119 = vector.broadcast %cst_61 : f32 to vector<8x64xf32>
      %120 = arith.addf %119, %118 : vector<8x64xf32>
      %121 = arith.divf %119, %120 : vector<8x64xf32>
      %122 = arith.mulf %113, %arg25 : vector<8x64xf32>
      %123 = arith.mulf %107, %115 : vector<8x64xf32>
      %124 = arith.addf %122, %123 : vector<8x64xf32>
      %125 = math.tanh %124 : vector<8x64xf32>
      %126 = arith.mulf %121, %125 : vector<8x64xf32>
      %127 = vector.broadcast %arg21 : i32 to vector<8x1xi32>
      %128 = arith.cmpi slt, %127, %8 : vector<8x1xi32>
      %129 = vector.broadcast %arg21 : i32 to vector<8x1xi32>
      %130 = arith.cmpi slt, %129, %9 : vector<8x1xi32>
      %131 = vector.shape_cast %128 : vector<8x1xi1> to vector<8x1xi1>
      %132 = vector.broadcast %131 : vector<8x1xi1> to vector<8x64xi1>
      %133 = arith.select %132, %101, %arg22 : vector<8x64xi1>, vector<8x64xf32>
      %134 = vector.shape_cast %128 : vector<8x1xi1> to vector<8x1xi1>
      %135 = vector.broadcast %134 : vector<8x1xi1> to vector<8x64xi1>
      %136 = arith.select %135, %99, %arg23 : vector<8x64xi1>, vector<8x64xf32>
      %137 = vector.shape_cast %130 : vector<8x1xi1> to vector<8x1xi1>
      %138 = vector.broadcast %137 : vector<8x1xi1> to vector<8x64xi1>
      %139 = arith.select %138, %126, %arg24 : vector<8x64xi1>, vector<8x64xf32>
      %140 = vector.shape_cast %130 : vector<8x1xi1> to vector<8x1xi1>
      %141 = vector.broadcast %140 : vector<8x1xi1> to vector<8x64xi1>
      %142 = arith.select %141, %124, %arg25 : vector<8x64xi1>, vector<8x64xf32>
      scf.yield %133, %136, %139, %142 : vector<8x64xf32>, vector<8x64xf32>, vector<8x64xf32>, vector<8x64xf32>
    }
    %cst_26 = arith.constant 0.000000e+00 : f32
    %19 = vector.broadcast %cst_26 : f32 to vector<8x64xf32>
    %20 = arith.maximumf %18#0, %19 : vector<8x64xf32>
    %cst_27 = arith.constant 0.000000e+00 : f32
    %21 = vector.broadcast %cst_27 : f32 to vector<8x64xf32>
    %22 = arith.maximumf %18#2, %21 : vector<8x64xf32>
    %23 = tpu.concatenate %20, %22 in 1 : vector<8x64xf32>, vector<8x64xf32> -> vector<8x128xf32>
    %c0_28 = arith.constant 0 : index
    %c0_29 = arith.constant 0 : index
    %24 = vector.load %arg11[%c0_28, %c0_29] : memref<128x128xf32, #tpu.memory_space<vmem>>, vector<128x128xf32>
    %cst_30 = arith.constant dense<0.000000e+00> : vector<8x128xf32>
    %25 = tpu.matmul %23, %24, %cst_30 {dimension_numbers = #tpu.dot_dimension_numbers<[1], [0], [0], [1], [0, 0, 1, 1], [], []>} : vector<8x128xf32>, vector<128x128xf32>, vector<8x128xf32> -> vector<8x128xf32>
    %c0_31 = arith.constant 0 : index
    %c0_32 = arith.constant 0 : index
    %26 = vector.load %arg12[%c0_31, %c0_32] : memref<1x128xf32, #tpu.memory_space<vmem>>, vector<1x128xf32>
    %27 = vector.broadcast %26 : vector<1x128xf32> to vector<8x128xf32>
    %28 = arith.addf %25, %27 : vector<8x128xf32>
    %cst_33 = arith.constant 0.000000e+00 : f32
    %29 = vector.broadcast %cst_33 : f32 to vector<8x128xf32>
    %30 = arith.maximumf %28, %29 : vector<8x128xf32>
    %c0_34 = arith.constant 0 : index
    %c0_35 = arith.constant 0 : index
    %31 = vector.load %arg13[%c0_34, %c0_35] : memref<128x5xf32, #tpu.memory_space<vmem>>, vector<128x5xf32>
    %cst_36 = arith.constant dense<0.000000e+00> : vector<8x5xf32>
    %32 = tpu.matmul %30, %31, %cst_36 {dimension_numbers = #tpu.dot_dimension_numbers<[1], [0], [0], [1], [0, 0, 1, 1], [], []>} : vector<8x128xf32>, vector<128x5xf32>, vector<8x5xf32> -> vector<8x5xf32>
    %c0_37 = arith.constant 0 : index
    %c0_38 = arith.constant 0 : index
    %33 = vector.load %arg14[%c0_37, %c0_38] : memref<1x5xf32, #tpu.memory_space<vmem>>, vector<1x5xf32>
    %34 = vector.broadcast %33 : vector<1x5xf32> to vector<8x5xf32>
    %35 = arith.addf %32, %34 : vector<8x5xf32>
    %cst_39 = arith.constant dense<0xFF800000> : vector<8xf32>
    %36 = vector.multi_reduction <maximumf>, %35, %cst_39 [1] : vector<8x5xf32> to vector<8xf32>
    %37 = vector.shape_cast %36 : vector<8xf32> to vector<8x1xf32>
    %38 = vector.broadcast %37 : vector<8x1xf32> to vector<8x5xf32>
    %39 = arith.subf %35, %38 : vector<8x5xf32>
    %40 = math.exp %39 : vector<8x5xf32>
    %cst_40 = arith.constant dense<0.000000e+00> : vector<8xf32>
    %41 = vector.multi_reduction <add>, %40, %cst_40 [1] : vector<8x5xf32> to vector<8xf32>
    %42 = vector.shape_cast %41 : vector<8xf32> to vector<8x1xf32>
    %43 = math.log %42 : vector<8x1xf32>
    %44 = arith.addf %43, %37 : vector<8x1xf32>
    %45 = vector.broadcast %44 : vector<8x1xf32> to vector<8x5xf32>
    %46 = arith.subf %35, %45 : vector<8x5xf32>
    %c0_41 = arith.constant 0 : index
    %c0_42 = arith.constant 0 : index
    %47 = vector.load %arg17[%c0_41, %c0_42] : memref<8x5xf32, #tpu.memory_space<vmem>>, vector<8x5xf32>
    tpu.vector_store %arg17[%c0_41, %c0_42], %46 {strides = array<i32>} : memref<8x5xf32, #tpu.memory_space<vmem>>, vector<8x5xf32>,
    %c0_43 = arith.constant 0 : index
    %c0_44 = arith.constant 0 : index
    %48 = vector.load %arg15[%c0_43, %c0_44] : memref<128x1xf32, #tpu.memory_space<vmem>>, vector<128x1xf32>
    %cst_45 = arith.constant dense<0.000000e+00> : vector<8x1xf32>
    %49 = tpu.matmul %30, %48, %cst_45 {dimension_numbers = #tpu.dot_dimension_numbers<[1], [0], [0], [1], [0, 0, 1, 1], [], []>} : vector<8x128xf32>, vector<128x1xf32>, vector<8x1xf32> -> vector<8x1xf32>
    %c0_46 = arith.constant 0 : index
    %c0_47 = arith.constant 0 : index
    %50 = vector.load %arg16[%c0_46, %c0_47] : memref<1x1xf32, #tpu.memory_space<vmem>>, vector<1x1xf32>
    %51 = vector.broadcast %50 : vector<1x1xf32> to vector<8x1xf32>
    %52 = arith.addf %49, %51 : vector<8x1xf32>
    %53 = arith.negf %52 : vector<8x1xf32>
    %54 = math.exp %53 : vector<8x1xf32>
    %cst_48 = arith.constant 1.000000e+00 : f32
    %55 = vector.broadcast %cst_48 : f32 to vector<8x1xf32>
    %56 = arith.addf %55, %54 : vector<8x1xf32>
    %57 = arith.divf %55, %56 : vector<8x1xf32>
    %c0_49 = arith.constant 0 : index
    %c0_50 = arith.constant 0 : index
    %58 = vector.load %arg18[%c0_49, %c0_50] : memref<8x1xf32, #tpu.memory_space<vmem>>, vector<8x1xf32>
    tpu.vector_store %arg18[%c0_49, %c0_50], %57 {strides = array<i32>} : memref<8x1xf32, #tpu.memory_space<vmem>>, vector<8x1xf32>,
    return
  }
}

</mosaic_0001>

<bundles_post_ra>
// kernel: tpu_custom_call.1
= control target key start
LH: loop header
LB: loop body
LE: loop exit
PB: predicated region body
PF: predicated region fallthrough
CT: control target
= control target key end

     0   :  { %s3225_s0 = inlined_call_operand.<no memory space> [shape: s32[1], index: 0, kind: input, shape index: {}]   ;;  %s3226_s1 = inlined_call_operand.vmem [shape: s32[8,1], index: 1, kind: input, shape index: {}]   ;;  %s3227_s2 = inlined_call_operand.vmem [shape: s32[8,1], index: 2, kind: input, shape index: {}]   ;;  %s3228_s3 = inlined_call_operand.hbm [shape: f32[64,300], index: 3, kind: input, shape index: {}]   ;;  %s3229_s4 = inlined_call_operand.vmem [shape: f32[96,300], index: 4, kind: input, shape index: {}]   ;;  %s3230_s5 = inlined_call_operand.hbm [shape: f32[300,256], index: 5, kind: input, shape index: {}]   ;;  %s3231_s6 = inlined_call_operand.hbm [shape: f32[64,256], index: 6, kind: input, shape index: {}]   ;;  %s3232_s7 = inlined_call_operand.vmem [shape: f32[1,256], index: 7, kind: input, shape index: {}]   ;;  %s3233_s8 = inlined_call_operand.hbm [shape: f32[300,256], index: 8, kind: input, shape index: {}]   ;;  %s3234_s9 = inlined_call_operand.hbm [shape: f32[64,256], index: 9, kind: input, shape index: {}]   ;;  %s3235_s10 = inlined_call_operand.vmem [shape: f32[1,256], index: 10, kind: input, shape index: {}]   ;;  %s3236_s11 = inlined_call_operand.hbm [shape: f32[128,128], index: 11, kind: input, shape index: {}]   ;;  %s3237_s12 = inlined_call_operand.vmem [shape: f32[1,128], index: 12, kind: input, shape index: {}]   ;;  %s3238_s13 = inlined_call_operand.vmem [shape: f32[128,5], index: 13, kind: input, shape index: {}]   ;;  %s3239_s14 = inlined_call_operand.vmem [shape: f32[1,5], index: 14, kind: input, shape index: {}]   ;;  %s3240_s15 = inlined_call_operand.vmem [shape: f32[128,1], index: 15, kind: input, shape index: {}]   ;;  %s3241_s16 = inlined_call_operand.<no memory space> [shape: f32[1,1], index: 16, kind: input, shape index: {}]   ;;  %s3242_s17 = inlined_call_operand.hbm [shape: f32[8,5], index: 17, kind: output, shape index: {0}]   ;;  %s3243_s18 = inlined_call_operand.vmem [shape: f32[8,1], index: 18, kind: output, shape index: {1}]  }
   0x1   :  { %3244 = sst [smem:[#allocation23_spill]] %s3225_s0  ;;  %v25_v0 = vstv %s3241_s16 }
   0x2   :  { %3245 = sst [smem:[#allocation24_spill]] %s3226_s1  ;;  %26 = vst [vmem:[#allocation5] sm:$0x1] %v25_v0 }
   0x3   :  { %3246 = sst [smem:[#allocation25_spill]] %s3227_s2 }
   0x4   :  { %27 = vsyncpa [#allocation7], 0 }
   0x5   :  { %28 = vsyncpa [#allocation10], 0 }
   0x6   :  { %29 = vsyncpa [#allocation13], 0 }
   0x7   :  { %30 = vsyncpa [#allocation16], 0 }
   0x8   :  { %31 = vsyncpa [#allocation8], 0  ;;  %s2471_s29 = smov [#allocation9]   ;;  %s2251_s1 = scalar_lea.hbm %s3230_s5, 9728 }
   0x9   :  { %s57_s30 = sshll.u32 %s2471_s29, 4  ;;  %p2252_p0 = scmp.ne.s32.totalorder %s3230_s5, %s2251_s1  ;;  %s58_s30 = int_to_ptr.vmem [resolvable:$true] %s57_s30 }
   0xa   :  { %p2255_p1 = scmp.lt.u32.totalorder %s2251_s1, %s3230_s5 }
   0xc   :  { %p2257_p2 = pnand %p2255_p1, %p2252_p0 }
   0xe   :  { %2260 = shalt.err (!%p2257_p2)
}
   0xf   :  { %s2261_s16 = scalar_lea.vmem %s58_s30, 9728  ;;  %p2266_p4 = scmp.lt.s32.totalorder %s58_s30, %s58_s30 }
  0x10   :  { %p2262_p3 = scmp.ne.s32.totalorder %s58_s30, %s2261_s16  ;;  %p2267_p5 = scmp.lt.s32.totalorder %s2261_s16, %s2261_s16 }
  0x12   :  { %p2268_p6 = por %p2267_p5, %p2266_p4 }
  0x14   :  { %p2269_p7 = pnand %p2268_p6, %p2262_p3 }
  0x16   :  { %2272 = shalt.err (!%p2269_p7)
}
  0x17   :  { %s2472_s23 = smov 256   ;;  %s2473_s24 = smov 16  }
  0x18   :  { %63 = dma.hbm_to_vmem [thread:$0]  %s3230_s5, 9728, %s58_s30, [#allocation10], %s2472_s23, %s2472_s23, %s2473_s24  }
  0x19   :  { %s2474_s27 = smov [#allocation12]   ;;  %s2475_s29 = smov [#allocation6]  }
  0x1a   :  { %s83_s28 = sshll.u32 %s2474_s27, 4  ;;  %s43_s0 = sshll.u32 %s2475_s29, 4  ;;  %s84_s28 = int_to_ptr.vmem [resolvable:$true] %s83_s28  ;;  %s44_s0 = int_to_ptr.vmem [resolvable:$true] %s43_s0 }
  0x1b   :  { %s2273_s20 = scalar_lea.hbm %s3233_s8, 9728 }
  0x1c   :  { %p2274_p8 = scmp.ne.s32.totalorder %s3233_s8, %s2273_s20  ;;  %p2277_p9 = scmp.lt.u32.totalorder %s2273_s20, %s3233_s8 }
  0x1e   :  { %p2279_p10 = pnand %p2277_p9, %p2274_p8 }
  0x20   :  { %2282 = shalt.err (!%p2279_p10)
}
  0x21   :  { %s2283_s5 = scalar_lea.vmem %s84_s28, 9728  ;;  %p2288_p12 = scmp.lt.s32.totalorder %s84_s28, %s84_s28 }
  0x22   :  { %p2284_p11 = scmp.ne.s32.totalorder %s84_s28, %s2283_s5  ;;  %p2289_p13 = scmp.lt.s32.totalorder %s2283_s5, %s2283_s5 }
  0x24   :  { %p2290_p0 = por %p2289_p13, %p2288_p12 }
  0x26   :  { %p2291_p1 = pnand %p2290_p0, %p2284_p11 }
  0x28   :  { %2294 = shalt.err (!%p2291_p1)
}
  0x29   :  { %89 = dma.hbm_to_vmem [thread:$0]  %s3233_s8, 9728, %s84_s28, [#allocation13], %s2472_s23, %s2472_s23, %s2473_s24  }
  0x2a   :  { %s2295_s29 = scalar_lea.hbm %s3228_s3, 3072 }
  0x2b   :  { %p2296_p2 = scmp.ne.s32.totalorder %s3228_s3, %s2295_s29  ;;  %p2299_p3 = scmp.lt.u32.totalorder %s2295_s29, %s3228_s3 }
  0x2d   :  { %p2301_p4 = pnand %p2299_p3, %p2296_p2 }
  0x2f   :  { %2304 = shalt.err (!%p2301_p4)
}
  0x30   :  { %s2305_s22 = scalar_lea.vmem %s44_s0, 3072  ;;  %p2310_p6 = scmp.lt.s32.totalorder %s44_s0, %s44_s0 }
  0x31   :  { %p2306_p5 = scmp.ne.s32.totalorder %s44_s0, %s2305_s22  ;;  %p2311_p7 = scmp.lt.s32.totalorder %s2305_s22, %s2305_s22 }
  0x33   :  { %p2312_p8 = por %p2311_p7, %p2310_p6 }
  0x35   :  { %p2313_p9 = pnand %p2312_p8, %p2306_p5 }
  0x37   :  { %2316 = shalt.err (!%p2313_p9)
}
  0x38   :  { %s2476_s8 = smov 384   ;;  %s2477_s28 = smov 24  }
  0x39   :  { %49 = dma.hbm_to_vmem [thread:$0]  %s3228_s3, 3072, %s44_s0, [#allocation7], %s2476_s8, %s2476_s8, %s2477_s28  }
  0x3a   :  { %s2478_s5 = smov [#allocation11]   ;;  %s2479_s25 = smov [#allocation14]  }
  0x3b   :  { %s69_s30 = sshll.u32 %s2478_s5, 4  ;;  %s95_s26 = sshll.u32 %s2479_s25, 4  ;;  %s70_s30 = int_to_ptr.vmem [resolvable:$true] %s69_s30  ;;  %s96_s26 = int_to_ptr.vmem [resolvable:$true] %s95_s26 }
  0x3c   :  { %s2317_s19 = scalar_lea.hbm %s3231_s6, 2048 }
  0x3d   :  { %p2318_p10 = scmp.ne.s32.totalorder %s3231_s6, %s2317_s19  ;;  %p2321_p11 = scmp.lt.u32.totalorder %s2317_s19, %s3231_s6 }
  0x3f   :  { %p2323_p12 = pnand %p2321_p11, %p2318_p10 }
  0x41   :  { %2326 = shalt.err (!%p2323_p12)
}
  0x42   :  { %s2327_s3 = scalar_lea.vmem %s70_s30, 2048  ;;  %p2332_p0 = scmp.lt.s32.totalorder %s70_s30, %s70_s30 }
  0x43   :  { %p2328_p13 = scmp.ne.s32.totalorder %s70_s30, %s2327_s3  ;;  %p2333_p1 = scmp.lt.s32.totalorder %s2327_s3, %s2327_s3 }
  0x45   :  { %p2334_p2 = por %p2333_p1, %p2332_p0 }
  0x47   :  { %p2335_p3 = pnand %p2334_p2, %p2328_p13 }
  0x49   :  { %2338 = shalt.err (!%p2335_p3)
}
  0x4a   :  { %75 = dma.hbm_to_vmem [thread:$0]  %s3231_s6, 2048, %s70_s30, [#allocation10], %s2472_s23, %s2472_s23, %s2473_s24  }
  0x4b   :  { %s2339_s16 = scalar_lea.hbm %s3234_s9, 2048 }
  0x4c   :  { %p2340_p4 = scmp.ne.s32.totalorder %s3234_s9, %s2339_s16  ;;  %p2343_p5 = scmp.lt.u32.totalorder %s2339_s16, %s3234_s9 }
  0x4e   :  { %p2345_p6 = pnand %p2343_p5, %p2340_p4 }
  0x50   :  { %2348 = shalt.err (!%p2345_p6)
}
  0x51   :  { %s2349_s19 = scalar_lea.vmem %s96_s26, 2048  ;;  %p2354_p8 = scmp.lt.s32.totalorder %s96_s26, %s96_s26 }
  0x52   :  { %p2350_p7 = scmp.ne.s32.totalorder %s96_s26, %s2349_s19  ;;  %p2355_p9 = scmp.lt.s32.totalorder %s2349_s19, %s2349_s19 }
  0x54   :  { %p2356_p10 = por %p2355_p9, %p2354_p8 }
  0x56   :  { %p2357_p11 = pnand %p2356_p10, %p2350_p7 }
  0x58   :  { %2360 = shalt.err (!%p2357_p11)
}
  0x59   :  { %101 = dma.hbm_to_vmem [thread:$0]  %s3234_s9, 2048, %s96_s26, [#allocation13], %s2472_s23, %s2472_s23, %s2473_s24  }
  0x5a   :  { %s2480_s1 = smov [#allocation15]   ;;  %s2361_s3 = scalar_lea.hbm %s3236_s11, 2048 }
  0x5b   :  { %s109_s20 = sshll.u32 %s2480_s1, 4  ;;  %p2362_p12 = scmp.ne.s32.totalorder %s3236_s11, %s2361_s3  ;;  %s110_s20 = int_to_ptr.vmem [resolvable:$true] %s109_s20 }
  0x5c   :  { %p2365_p13 = scmp.lt.u32.totalorder %s2361_s3, %s3236_s11 }
  0x5e   :  { %p2367_p0 = pnand %p2365_p13, %p2362_p12 }
  0x60   :  { %2370 = shalt.err (!%p2367_p0)
}
  0x61   :  { %s2371_s16 = scalar_lea.vmem %s110_s20, 2048  ;;  %p2376_p2 = scmp.lt.s32.totalorder %s110_s20, %s110_s20 }
  0x62   :  { %p2372_p1 = scmp.ne.s32.totalorder %s110_s20, %s2371_s16  ;;  %p2377_p3 = scmp.lt.s32.totalorder %s2371_s16, %s2371_s16 }
  0x64   :  { %p2378_p4 = por %p2377_p3, %p2376_p2 }
  0x66   :  { %p2379_p5 = pnand %p2378_p4, %p2372_p1 }
  0x68   :  { %2382 = shalt.err (!%p2379_p5)
}
  0x69   :  { %s2481_s9 = smov 128   ;;  %s2482_s23 = smov 8  }
  0x6a   :  { %115 = dma.hbm_to_vmem [thread:$0]  %s3236_s11, 2048, %s110_s20, [#allocation16], %s2481_s9, %s2481_s9, %s2482_s23  }
  0x6b   :  { %2433 = dma.done.wait [#allocation7], 3072  }
  0x6c   :  { %2434 = vsyncadd [#allocation7], 4294964224 }
  0x6d   :  { %2435 = dma.done.wait [#allocation10], 11776  }
  0x6e   :  { %2436 = vsyncadd [#allocation10], 4294955520 }
  0x6f   :  { %2437 = dma.done.wait [#allocation13], 11776  }
  0x70   :  { %2438 = vsyncadd [#allocation13], 4294955520 }
  0x71   :  { %2439 = dma.done.wait [#allocation16], 2048  }
  0x72   :  { %2440 = vsyncadd [#allocation16], 4294965248  ;;  %s3247_s27 = sld [smem:[#allocation24_spill]]  ;;  %s3248_s6 = sld [smem:[#allocation25_spill]]  ;;  %v2687_v3 = vld [vmem:[%s3232_s7] sm:$0x3] }
  0x73   :  { %v2692_v4 = vld [vmem:[%s3235_s10] sm:$0x3]  ;;  %v2696_v6 = vld [vmem:[#allocation11 + $0x8] sm:$0xff]  ;;  %v2698_v7 = vld [vmem:[#allocation11 + $0x10] sm:$0xff]  ;;  %vm269_vm0 = vcmask 1043456   ;;  %vm2483_vm1 = vmmov 1  }
  0x74   :  { %v2694_v5 = vld [vmem:[#allocation11] sm:$0xff]  ;;  %v2700_v8 = vld [vmem:[#allocation11 + $0x18] sm:$0xff]  ;;  %v2704_v10 = vld [vmem:[#allocation11 + $0x28] sm:$0xff]  ;;  %vm244_vm3 = vcmask 359424   ;;  %s3251_s10 = sld [smem:[#allocation23_spill]] }
  0x75   :  { %v2702_v9 = vld [vmem:[#allocation11 + $0x20] sm:$0xff]  ;;  %v2706_v11 = vld [vmem:[#allocation11 + $0x30] sm:$0xff]  ;;  %v2708_v12 = vld [vmem:[#allocation11 + $0x38] sm:$0xff] }
  0x76   :  { %v2710_v13 = vld [vmem:[#allocation11 + $0x40] sm:$0xff]  ;;  %v2712_v14 = vld [vmem:[#allocation11 + $0x48] sm:$0xff]  ;;  %v2714_v15 = vld [vmem:[#allocation11 + $0x50] sm:$0xff] }
  0x77   :  { %v2716_v16 = vld [vmem:[#allocation11 + $0x58] sm:$0xff]  ;;  %v2718_v17 = vld [vmem:[#allocation11 + $0x60] sm:$0xff]  ;;  %v2720_v18 = vld [vmem:[#allocation11 + $0x68] sm:$0xff] }
  0x78   :  { %v2677_v1 = vld [vmem:[%s3247_s27] sm:$0xff]  ;;  %v2722_v19 = vld [vmem:[#allocation11 + $0x70] sm:$0xff]  ;;  %v2728_v22 = vld [vmem:[#allocation14 + $0x8] sm:$0xff] }
  0x79   :  { %v2682_v2 = vld [vmem:[%s3248_s6] sm:$0xff]  ;;  %v2730_v23 = vld [vmem:[#allocation14 + $0x10] sm:$0xff]  ;;  %v2736_v26 = vld [vmem:[#allocation14 + $0x28] sm:$0xff] }
  0x7a   :  { %v2724_v20 = vld [vmem:[#allocation11 + $0x78] sm:$0xff]  ;;  %v2726_v21 = vld [vmem:[#allocation14] sm:$0xff]  ;;  %v2738_v27 = vld [vmem:[#allocation14 + $0x30] sm:$0xff]  ;;  %p1659_p6 = scmp.le.s32.totalorder %s3251_s10, 0 }
  0x7b   :  { %v2732_v24 = vld [vmem:[#allocation14 + $0x18] sm:$0xff]  ;;  %v2734_v25 = vld [vmem:[#allocation14 + $0x20] sm:$0xff]  ;;  %v2744_v30 = vld [vmem:[#allocation14 + $0x48] sm:$0xff]  ;;  %s2980_s21 = smov (!%p1659_p6), 0  }
  0x7c   :  { %v2740_v28 = vld [vmem:[#allocation14 + $0x38] sm:$0xff]  ;;  %v2742_v29 = vld [vmem:[#allocation14 + $0x40] sm:$0xff]  ;;  %v2746_v31 = vld [vmem:[#allocation14 + $0x50] sm:$0xff] }
  0x7d   :  { %v2748_v32 = vld [vmem:[#allocation14 + $0x58] sm:$0xff]  ;;  %v2750_v33 = vld [vmem:[#allocation14 + $0x60] sm:$0xff]  ;;  %v2752_v34 = vld [vmem:[#allocation14 + $0x68] sm:$0xff] }
  0x7e   :  { %v2754_v35 = vld [vmem:[#allocation14 + $0x70] sm:$0xff]  ;;  %v2756_v36 = vld [vmem:[#allocation14 + $0x78] sm:$0xff]  ;;  %v169_v37 = vld [vmem:[#allocation9 + $0x8] sm:$0xff] }
  0x7f   :  { %v171_v38 = vld [vmem:[#allocation9 + $0x18] sm:$0xff]  ;;  %v555_v39 = vld [vmem:[#allocation12 + $0x8] sm:$0xff]  ;;  %v168_v42 = vld [vmem:[#allocation9] sm:$0xff] }
  0x80   :  { %v1834_v40 = vpack.c.bf16 %v171_v38, %v169_v37  ;;  %v557_v41 = vld [vmem:[#allocation12 + $0x18] sm:$0xff]  ;;  %v170_v43 = vld [vmem:[#allocation9 + $0x10] sm:$0xff]  ;;  %v554_v46 = vld [vmem:[#allocation12] sm:$0xff] }
  0x81   :  { %v1912_v44 = vpack.c.bf16 %v557_v41, %v555_v39  ;;  %v1836_v45 = vpack.c.bf16 %v170_v43, %v168_v42  ;;  %v556_v47 = vld [vmem:[#allocation12 + $0x10] sm:$0xff]  ;;  %v173_v48 = vld [vmem:[#allocation9 + $0x28] sm:$0xff]  ;;  %v175_v50 = vld [vmem:[#allocation9 + $0x38] sm:$0xff] }
  0x82   :  { %1835 = vmatprep.subr.bf16.mxu0 %v1834_v40  ;;  %v1914_v49 = vpack.c.bf16 %v556_v47, %v554_v46  ;;  %v559_v51 = vld [vmem:[#allocation12 + $0x28] sm:$0xff]  ;;  %v561_v52 = vld [vmem:[#allocation12 + $0x38] sm:$0xff]  ;;  %v1838_v53 = vpack.c.bf16 %v175_v50, %v173_v48  ;;  %v172_v55 = vld [vmem:[#allocation9 + $0x20] sm:$0xff] }
  0x83   :  { %1913 = vmatprep.subr.bf16.mxu1 %v1912_v44  ;;  %1837 = vmatpush1.bf16.msra.mxu0 %v1836_v45  ;;  %v1916_v54 = vpack.c.bf16 %v561_v52, %v559_v51  ;;  %v174_v56 = vld [vmem:[#allocation9 + $0x30] sm:$0xff]  ;;  %v558_v57 = vld [vmem:[#allocation12 + $0x20] sm:$0xff]  ;;  %v177_v60 = vld [vmem:[#allocation9 + $0x48] sm:$0xff] }
  0x84   :  { %1915 = vmatpush1.bf16.msra.mxu1 %v1914_v49  ;;  %v1840_v58 = vpack.c.bf16 %v174_v56, %v172_v55  ;;  %v560_v59 = vld [vmem:[#allocation12 + $0x30] sm:$0xff]  ;;  %v179_v61 = vld [vmem:[#allocation9 + $0x58] sm:$0xff]  ;;  %1839 = vmatprep.subr.bf16.mxu0 %v1838_v53  ;;  %v563_v0 = vld [vmem:[#allocation12 + $0x48] sm:$0xff] }
  0x85   :  { %1917 = vmatprep.subr.bf16.mxu1 %v1916_v54  ;;  %v1918_v62 = vpack.c.bf16 %v560_v59, %v558_v57  ;;  %v1842_v63 = vpack.c.bf16 %v179_v61, %v177_v60  ;;  %v565_v37 = vld [vmem:[#allocation12 + $0x58] sm:$0xff]  ;;  %v176_v38 = vld [vmem:[#allocation9 + $0x40] sm:$0xff]  ;;  %v178_v40 = vld [vmem:[#allocation9 + $0x50] sm:$0xff] }
  0x86   :  { %v1920_v39 = vpack.c.bf16 %v565_v37, %v563_v0  ;;  %v562_v41 = vld [vmem:[#allocation12 + $0x40] sm:$0xff]  ;;  %v564_v42 = vld [vmem:[#allocation12 + $0x50] sm:$0xff]  ;;  %v1844_v43 = vpack.c.bf16 %v178_v40, %v176_v38  ;;  %v181_v44 = vld [vmem:[#allocation9 + $0x68] sm:$0xff] }
  0x87   :  { %1841 = vmatpush1.bf16.msra.mxu0 %v1840_v58  ;;  %v183_v45 = vld [vmem:[#allocation9 + $0x78] sm:$0xff]  ;;  %v567_v46 = vld [vmem:[#allocation12 + $0x68] sm:$0xff]  ;;  %v1922_v47 = vpack.c.bf16 %v564_v42, %v562_v41  ;;  %v180_v50 = vld [vmem:[#allocation9 + $0x60] sm:$0xff] }
  0x88   :  { %1919 = vmatpush1.bf16.msra.mxu1 %v1918_v62  ;;  %1843 = vmatprep.subr.bf16.mxu0 %v1842_v63  ;;  %v1846_v48 = vpack.c.bf16 %v183_v45, %v181_v44  ;;  %v569_v49 = vld [vmem:[#allocation12 + $0x78] sm:$0xff]  ;;  %v182_v51 = vld [vmem:[#allocation9 + $0x70] sm:$0xff]  ;;  %v566_v53 = vld [vmem:[#allocation12 + $0x60] sm:$0xff] }
  0x89   :  { %1921 = vmatprep.subr.bf16.mxu1 %v1920_v39  ;;  %v1924_v52 = vpack.c.bf16 %v569_v49, %v567_v46  ;;  %v568_v54 = vld [vmem:[#allocation12 + $0x70] sm:$0xff]  ;;  %v185_v55 = vld [vmem:[#allocation9 + $0x88] sm:$0xff]  ;;  %v187_v56 = vld [vmem:[#allocation9 + $0x98] sm:$0xff]  ;;  %v1848_v58 = vpack.c.bf16 %v182_v51, %v180_v50 }
  0x8a   :  { %v571_v57 = vld [vmem:[#allocation12 + $0x88] sm:$0xff]  ;;  %v573_v59 = vld [vmem:[#allocation12 + $0x98] sm:$0xff]  ;;  %v1926_v60 = vpack.c.bf16 %v568_v54, %v566_v53  ;;  %v1850_v61 = vpack.c.bf16 %v187_v56, %v185_v55  ;;  %v184_v62 = vld [vmem:[#allocation9 + $0x80] sm:$0xff] }
  0x8b   :  { %1845 = vmatpush1.bf16.msra.mxu0 %v1844_v43  ;;  %v186_v63 = vld [vmem:[#allocation9 + $0x90] sm:$0xff]  ;;  %v570_v0 = vld [vmem:[#allocation12 + $0x80] sm:$0xff]  ;;  %v1928_v37 = vpack.c.bf16 %v573_v59, %v571_v57  ;;  %v189_v39 = vld [vmem:[#allocation9 + $0xa8] sm:$0xff] }
  0x8c   :  { %1923 = vmatpush1.bf16.msra.mxu1 %v1922_v47  ;;  %1847 = vmatprep.subr.bf16.mxu0 %v1846_v48  ;;  %v572_v38 = vld [vmem:[#allocation12 + $0x90] sm:$0xff]  ;;  %v191_v40 = vld [vmem:[#allocation9 + $0xb8] sm:$0xff]  ;;  %v575_v41 = vld [vmem:[#allocation12 + $0xa8] sm:$0xff]  ;;  %v1852_v44 = vpack.c.bf16 %v186_v63, %v184_v62 }
  0x8d   :  { %1925 = vmatprep.subr.bf16.mxu1 %v1924_v52  ;;  %v577_v42 = vld [vmem:[#allocation12 + $0xb8] sm:$0xff]  ;;  %v1930_v43 = vpack.c.bf16 %v572_v38, %v570_v0  ;;  %v1854_v45 = vpack.c.bf16 %v191_v40, %v189_v39  ;;  %v188_v46 = vld [vmem:[#allocation9 + $0xa0] sm:$0xff]  ;;  %v190_v47 = vld [vmem:[#allocation9 + $0xb0] sm:$0xff] }
  0x8e   :  { %v574_v48 = vld [vmem:[#allocation12 + $0xa0] sm:$0xff]  ;;  %v1932_v49 = vpack.c.bf16 %v577_v42, %v575_v41  ;;  %v576_v50 = vld [vmem:[#allocation12 + $0xb0] sm:$0xff]  ;;  %v193_v51 = vld [vmem:[#allocation9 + $0xc8] sm:$0xff]  ;;  %v1856_v55 = vpack.c.bf16 %v190_v47, %v188_v46 }
  0x8f   :  { %1849 = vmatpush1.bf16.msra.mxu0 %v1848_v58  ;;  %v195_v52 = vld [vmem:[#allocation9 + $0xd8] sm:$0xff]  ;;  %v579_v53 = vld [vmem:[#allocation12 + $0xc8] sm:$0xff]  ;;  %v1934_v56 = vpack.c.bf16 %v576_v50, %v574_v48  ;;  %v192_v59 = vld [vmem:[#allocation9 + $0xc0] sm:$0xff] }
  0x90   :  { %1927 = vmatpush1.bf16.msra.mxu1 %v1926_v60  ;;  %1851 = vmatprep.subr.bf16.mxu0 %v1850_v61  ;;  %v581_v54 = vld [vmem:[#allocation12 + $0xd8] sm:$0xff]  ;;  %v1858_v57 = vpack.c.bf16 %v195_v52, %v193_v51  ;;  %v194_v58 = vld [vmem:[#allocation9 + $0xd0] sm:$0xff]  ;;  %v578_v60 = vld [vmem:[#allocation12 + $0xc0] sm:$0xff] }
  0x91   :  { %1929 = vmatprep.subr.bf16.mxu1 %v1928_v37  ;;  %v1936_v61 = vpack.c.bf16 %v581_v54, %v579_v53  ;;  %v580_v62 = vld [vmem:[#allocation12 + $0xd0] sm:$0xff]  ;;  %v197_v63 = vld [vmem:[#allocation9 + $0xe8] sm:$0xff]  ;;  %v199_v0 = vld [vmem:[#allocation9 + $0xf8] sm:$0xff]  ;;  %v1860_v39 = vpack.c.bf16 %v194_v58, %v192_v59 }
  0x92   :  { %v583_v37 = vld [vmem:[#allocation12 + $0xe8] sm:$0xff]  ;;  %v585_v38 = vld [vmem:[#allocation12 + $0xf8] sm:$0xff]  ;;  %v1938_v40 = vpack.c.bf16 %v580_v62, %v578_v60  ;;  %v1862_v41 = vpack.c.bf16 %v199_v0, %v197_v63  ;;  %v196_v42 = vld [vmem:[#allocation9 + $0xe0] sm:$0xff] }
  0x93   :  { %1853 = vmatpush1.bf16.msra.mxu0 %v1852_v44  ;;  %v198_v44 = vld [vmem:[#allocation9 + $0xf0] sm:$0xff]  ;;  %v201_v47 = vld [vmem:[#allocation9 + $0x108] sm:$0xff]  ;;  %v203_v48 = vld [vmem:[#allocation9 + $0x118] sm:$0xff] }
  0x94   :  { %1931 = vmatpush1.bf16.msra.mxu1 %v1930_v43  ;;  %1855 = vmatprep.subr.bf16.mxu0 %v1854_v45  ;;  %v582_v43 = vld [vmem:[#allocation12 + $0xe0] sm:$0xff]  ;;  %v1940_v45 = vpack.c.bf16 %v585_v38, %v583_v37  ;;  %v584_v46 = vld [vmem:[#allocation12 + $0xf0] sm:$0xff]  ;;  %v589_v50 = vld [vmem:[#allocation12 + $0x118] sm:$0xff]  ;;  %v1864_v51 = vpack.c.bf16 %v198_v44, %v196_v42  ;;  %v1866_v53 = vpack.c.bf16 %v203_v48, %v201_v47 }
  0x95   :  { %1933 = vmatprep.subr.bf16.mxu1 %v1932_v49  ;;  %v587_v49 = vld [vmem:[#allocation12 + $0x108] sm:$0xff]  ;;  %v1942_v52 = vpack.c.bf16 %v584_v46, %v582_v43  ;;  %v200_v54 = vld [vmem:[#allocation9 + $0x100] sm:$0xff]  ;;  %v588_v59 = vld [vmem:[#allocation12 + $0x110] sm:$0xff] }
  0x96   :  { %v205_v58 = vld [vmem:[#allocation9 + $0x128] sm:$0xff]  ;;  %v207_v60 = vld [vmem:[#allocation9 + $0x138] sm:$0xff]  ;;  %v204_v38 = vld [vmem:[#allocation9 + $0x120] sm:$0xff] }
  0x97   :  { %1857 = vmatpush1.bf16.msra.mxu0 %v1856_v55  ;;  %v202_v55 = vld [vmem:[#allocation9 + $0x110] sm:$0xff]  ;;  %v593_v62 = vld [vmem:[#allocation12 + $0x138] sm:$0xff]  ;;  %v1870_v37 = vpack.c.bf16 %v207_v60, %v205_v58  ;;  %v209_v44 = vld [vmem:[#allocation9 + $0x148] sm:$0xff] }
  0x98   :  { %1935 = vmatpush1.bf16.msra.mxu1 %v1934_v56  ;;  %1859 = vmatprep.subr.bf16.mxu0 %v1858_v57  ;;  %v586_v56 = vld [vmem:[#allocation12 + $0x100] sm:$0xff]  ;;  %v1944_v57 = vpack.c.bf16 %v589_v50, %v587_v49  ;;  %v1868_v63 = vpack.c.bf16 %v202_v55, %v200_v54  ;;  %v592_v42 = vld [vmem:[#allocation12 + $0x130] sm:$0xff]  ;;  %v211_v43 = vld [vmem:[#allocation9 + $0x158] sm:$0xff] }
  0x99   :  { %1937 = vmatprep.subr.bf16.mxu1 %v1936_v61  ;;  %v591_v61 = vld [vmem:[#allocation12 + $0x128] sm:$0xff]  ;;  %v1946_v0 = vpack.c.bf16 %v588_v59, %v586_v56  ;;  %v597_v46 = vld [vmem:[#allocation12 + $0x158] sm:$0xff]  ;;  %v1874_v49 = vpack.c.bf16 %v211_v43, %v209_v44  ;;  %v208_v50 = vld [vmem:[#allocation9 + $0x140] sm:$0xff] }
  0x9a   :  { %v596_v54 = vld [vmem:[#allocation12 + $0x150] sm:$0xff]  ;;  %v213_v55 = vld [vmem:[#allocation9 + $0x168] sm:$0xff]  ;;  %v215_v56 = vld [vmem:[#allocation9 + $0x178] sm:$0xff] }
  0x9b   :  { %1861 = vmatpush1.bf16.msra.mxu0 %v1860_v39  ;;  %v206_v39 = vld [vmem:[#allocation9 + $0x130] sm:$0xff]  ;;  %v601_v59 = vld [vmem:[#allocation12 + $0x178] sm:$0xff]  ;;  %v212_v60 = vld [vmem:[#allocation9 + $0x160] sm:$0xff] }
  0x9c   :  { %1939 = vmatpush1.bf16.msra.mxu1 %v1938_v40  ;;  %1863 = vmatprep.subr.bf16.mxu0 %v1862_v41  ;;  %v590_v40 = vld [vmem:[#allocation12 + $0x120] sm:$0xff]  ;;  %v1948_v41 = vpack.c.bf16 %v593_v62, %v591_v61  ;;  %v1872_v47 = vpack.c.bf16 %v206_v39, %v204_v38  ;;  %v1878_v62 = vpack.c.bf16 %v215_v56, %v213_v55  ;;  %v217_v39 = vld [vmem:[#allocation9 + $0x188] sm:$0xff]  ;;  %v605_v44 = vld [vmem:[#allocation12 + $0x198] sm:$0xff] }
  0x9d   :  { %1941 = vmatprep.subr.bf16.mxu1 %v1940_v45  ;;  %v595_v45 = vld [vmem:[#allocation12 + $0x148] sm:$0xff]  ;;  %v1950_v48 = vpack.c.bf16 %v592_v42, %v590_v40  ;;  %v219_v40 = vld [vmem:[#allocation9 + $0x198] sm:$0xff]  ;;  %vm2785_vm2 = vmpackc.low %vm269_vm0, %vm2483_vm1 }
  0x9e   :  { %v603_v42 = vld [vmem:[#allocation12 + $0x188] sm:$0xff]  ;;  %v609_v56 = vld [vmem:[#allocation12 + $0x1b8] sm:$0xff] }
  0x9f   :  { %1865 = vmatpush1.bf16.msra.mxu0 %v1864_v51  ;;  %v210_v51 = vld [vmem:[#allocation9 + $0x150] sm:$0xff]  ;;  %v519_v43 = vld [vmem:[%s3229_s4 + $0x8] sm:$0xff] }
  0xa0   :  { %1943 = vmatpush1.bf16.msra.mxu1 %v1942_v52  ;;  %1867 = vmatprep.subr.bf16.mxu0 %v1866_v53  ;;  %v594_v52 = vld [vmem:[#allocation12 + $0x140] sm:$0xff]  ;;  %v1952_v53 = vpack.c.bf16 %v597_v46, %v595_v45  ;;  %v1876_v58 = vpack.c.bf16 %v210_v51, %v208_v50  ;;  %v1960_v51 = vpack.c.bf16 %v605_v44, %v603_v42  ;;  %v607_v55 = vld [vmem:[#allocation12 + $0x1a8] sm:$0xff] }
  0xa1   :  { %1945 = vmatprep.subr.bf16.mxu1 %v1944_v57  ;;  %v599_v57 = vld [vmem:[#allocation12 + $0x168] sm:$0xff]  ;;  %v1954_v61 = vpack.c.bf16 %v596_v54, %v594_v52  ;;  %736 = vmatprep.mubr.f32.mxu1 %v519_v43  ;;  %v602_v50 = vld [vmem:[#allocation12 + $0x180] sm:$0xff]  ;;  %v604_v52 = vld [vmem:[#allocation12 + $0x190] sm:$0xff] }
  0xa2   :  { %v1956_v38 = vpack.c.bf16 %v601_v59, %v599_v57  ;;  %v223_v54 = vld [vmem:[#allocation9 + $0x1b8] sm:$0xff]  ;;  %v1962_v59 = vpack.c.bf16 %v604_v52, %v602_v50  ;;  %v224_v43 = vld [vmem:[#allocation9 + $0x1c0] sm:$0xff] }
  0xa3   :  { %1869 = vmatpush1.bf16.msra.mxu0 %v1868_v63  ;;  %v214_v63 = vld [vmem:[#allocation9 + $0x170] sm:$0xff]  ;;  %v231_v50 = vld [vmem:[#allocation9 + $0x1f8] sm:$0xff] }
  0xa4   :  { %1947 = vmatpush1.bf16.msra.mxu1 %v1946_v0  ;;  %1871 = vmatprep.subr.bf16.mxu0 %v1870_v37  ;;  %v598_v0 = vld [vmem:[#allocation12 + $0x160] sm:$0xff]  ;;  %v600_v37 = vld [vmem:[#allocation12 + $0x170] sm:$0xff]  ;;  %v1880_v45 = vpack.c.bf16 %v214_v63, %v212_v60  ;;  %v1964_v63 = vpack.c.bf16 %v609_v56, %v607_v55  ;;  %v617_v52 = vld [vmem:[#allocation12 + $0x1f8] sm:$0xff] }
  0xa5   :  { %1949 = vmatprep.subr.bf16.mxu1 %v1948_v41  ;;  %v145_v41 = vld [vmem:[#allocation6 + $0x8] sm:$0xff]  ;;  %v1958_v46 = vpack.c.bf16 %v600_v37, %v598_v0  ;;  %v220_v60 = vld [vmem:[#allocation9 + $0x1a0] sm:$0xff]  ;;  %v608_v0 = vld [vmem:[#allocation12 + $0x1b0] sm:$0xff] }
  0xa6   :  { %340 = vmatprep.mubr.f32.mxu0 %v145_v41  ;;  %v225_v37 = vld [vmem:[#allocation9 + $0x1c8] sm:$0xff]  ;;  %v228_v56 = vld [vmem:[#allocation9 + $0x1e0] sm:$0xff] }
  0xa7   :  { %1873 = vmatpush1.bf16.msra.mxu0 %v1872_v47  ;;  %v1882_v47 = vpack.c.bf16 %v219_v40, %v217_v39  ;;  %v611_v39 = vld [vmem:[#allocation12 + $0x1c8] sm:$0xff]  ;;  %v613_v40 = vld [vmem:[#allocation12 + $0x1d8] sm:$0xff] }
  0xa8   :  { %1951 = vmatpush1.bf16.msra.mxu1 %v1950_v48  ;;  %1875 = vmatprep.subr.bf16.mxu0 %v1874_v49  ;;  %v216_v48 = vld [vmem:[#allocation9 + $0x180] sm:$0xff]  ;;  %v218_v49 = vld [vmem:[#allocation9 + $0x190] sm:$0xff] }
  0xa9   :  { %1953 = vmatprep.subr.bf16.mxu1 %v1952_v53  ;;  %v221_v53 = vld [vmem:[#allocation9 + $0x1a8] sm:$0xff]  ;;  %v1884_v57 = vpack.c.bf16 %v218_v49, %v216_v48  ;;  %v612_v48 = vld [vmem:[#allocation12 + $0x1d0] sm:$0xff] }
  0xaa   :  { %v229_v49 = vld [vmem:[#allocation9 + $0x1e8] sm:$0xff] }
  0xab   :  { %1877 = vmatpush1.bf16.msra.mxu0 %v1876_v58  ;;  %v1886_v58 = vpack.c.bf16 %v223_v54, %v221_v53  ;;  %v1894_v55 = vpack.c.bf16 %v231_v50, %v229_v49  ;;  %v623_v49 = vld [vmem:[#allocation12 + $0x228] sm:$0xff]  ;;  %v625_v50 = vld [vmem:[#allocation12 + $0x238] sm:$0xff] }
  0xac   :  { %1955 = vmatpush1.bf16.msra.mxu1 %v1954_v61  ;;  %1879 = vmatprep.subr.bf16.mxu0 %v1878_v62  ;;  %v222_v61 = vld [vmem:[#allocation9 + $0x1b0] sm:$0xff]  ;;  %v606_v62 = vld [vmem:[#allocation12 + $0x1a0] sm:$0xff] }
  0xad   :  { %1957 = vmatprep.subr.bf16.mxu1 %v1956_v38  ;;  %v227_v38 = vld [vmem:[#allocation9 + $0x1d8] sm:$0xff]  ;;  %v1888_v41 = vpack.c.bf16 %v222_v61, %v220_v60  ;;  %v1966_v42 = vpack.c.bf16 %v608_v0, %v606_v62  ;;  %v616_v60 = vld [vmem:[#allocation12 + $0x1f0] sm:$0xff]  ;;  %v233_v61 = vld [vmem:[#allocation9 + $0x208] sm:$0xff] }
  0xae   :  { %v1890_v44 = vpack.c.bf16 %v227_v38, %v225_v37  ;;  %v235_v62 = vld [vmem:[#allocation9 + $0x218] sm:$0xff] }
  0xaf   :  { %1881 = vmatpush1.bf16.msra.mxu0 %v1880_v45  ;;  %v226_v45 = vld [vmem:[#allocation9 + $0x1d0] sm:$0xff]  ;;  %v621_v0 = vld [vmem:[#allocation12 + $0x218] sm:$0xff] }
  0xb0   :  { %1959 = vmatpush1.bf16.msra.mxu1 %v1958_v46  ;;  %1883 = vmatprep.subr.bf16.mxu0 %v1882_v47  ;;  %v610_v46 = vld [vmem:[#allocation12 + $0x1c0] sm:$0xff]  ;;  %v1968_v47 = vpack.c.bf16 %v613_v40, %v611_v39  ;;  %v1892_v53 = vpack.c.bf16 %v226_v45, %v224_v43  ;;  %v1898_v39 = vpack.c.bf16 %v235_v62, %v233_v61  ;;  %v620_v43 = vld [vmem:[#allocation12 + $0x210] sm:$0xff]  ;;  %v237_v45 = vld [vmem:[#allocation9 + $0x228] sm:$0xff] }
  0xb1   :  { %1961 = vmatprep.subr.bf16.mxu1 %v1960_v51  ;;  %v615_v51 = vld [vmem:[#allocation12 + $0x1e8] sm:$0xff]  ;;  %v1970_v54 = vpack.c.bf16 %v612_v48, %v610_v46  ;;  %v232_v40 = vld [vmem:[#allocation9 + $0x200] sm:$0xff]  ;;  %v239_v46 = vld [vmem:[#allocation9 + $0x238] sm:$0xff] }
  0xb2   :  { %v241_v61 = vld [vmem:[#allocation9 + $0x248] sm:$0xff]  ;;  %v243_v62 = vld [vmem:[#allocation9 + $0x258] sm:$0xf] }
  0xb3   :  { %1885 = vmatpush1.bf16.msra.mxu0 %v1884_v57  ;;  %v230_v57 = vld [vmem:[#allocation9 + $0x1f0] sm:$0xff] }
  0xb4   :  { %1963 = vmatpush1.bf16.msra.mxu1 %v1962_v59  ;;  %1887 = vmatprep.subr.bf16.mxu0 %v1886_v58  ;;  %v614_v59 = vld [vmem:[#allocation12 + $0x1e0] sm:$0xff]  ;;  %v1972_v58 = vpack.c.bf16 %v617_v52, %v615_v51  ;;  %v1896_v37 = vpack.c.bf16 %v230_v57, %v228_v56  ;;  %v238_v57 = vld [vmem:[#allocation9 + $0x230] sm:$0xff] }
  0xb5   :  { %1965 = vmatprep.subr.bf16.mxu1 %v1964_v63  ;;  %v619_v63 = vld [vmem:[#allocation12 + $0x208] sm:$0xff]  ;;  %v1974_v38 = vpack.c.bf16 %v616_v60, %v614_v59  ;;  %v518_v51 = vld [vmem:[%s3229_s4] sm:$0xff]  ;;  %v624_v60 = vld [vmem:[#allocation12 + $0x230] sm:$0xff] }
  0xb6   :  { %v148_v52 = vld [vmem:[#allocation6 + $0x20] sm:$0xff] }
  0xb7   :  { %1889 = vmatpush1.bf16.msra.mxu0 %v1888_v41  ;;  %v234_v41 = vld [vmem:[#allocation9 + $0x210] sm:$0xff]  ;;  %v236_v56 = vld [vmem:[#allocation9 + $0x220] sm:$0xff] }
  0xb8   :  { %1967 = vmatpush1.bf16.msra.mxu1 %v1966_v42  ;;  %1891 = vmatprep.subr.bf16.mxu0 %v1890_v44  ;;  %v2761_v42 = vpack.c.bf16 %v621_v0, %v619_v63  ;;  %v618_v44 = vld [vmem:[#allocation12 + $0x200] sm:$0xff]  ;;  %v1900_v48 = vpack.c.bf16 %v234_v41, %v232_v40  ;;  %v147_v63 = vld [vmem:[#allocation6 + $0x18] sm:$0xff]  ;;  %v627_v0 = vld [vmem:[#allocation12 + $0x248] sm:$0xff]  ;;  %v1904_v40 = vpack.c.bf16 %v238_v57, %v236_v56 }
  0xb9   :  { %1969 = vmatprep.subr.bf16.mxu1 %v1968_v47  ;;  %v144_v47 = vld [vmem:[#allocation6] sm:$0xff]  ;;  %v525_v41 = vld [vmem:[%s3229_s4 + $0x38] sm:$0xff]  ;;  %v528_v56 = vld [vmem:[%s3229_s4 + $0x50] sm:$0xff] }
  0xba   :  { %v622_v59 = vld [vmem:[#allocation12 + $0x220] sm:$0xff] }
  0xbb   :  { %1893 = vmatpush1.bf16.msra.mxu0 %v1892_v53  ;;  %v522_v53 = vld [vmem:[%s3229_s4 + $0x20] sm:$0xff] }
  0xbc   :  { %1971 = vmatpush1.bf16.msra.mxu1 %v1970_v54  ;;  %1895 = vmatprep.subr.bf16.mxu0 %v1894_v55  ;;  %v2770_v54 = vpack.c.bf16 %v620_v43, %v618_v44  ;;  %v1902_v55 = vpack.c.bf16 %v239_v46, %v237_v45  ;;  %v2781_v44 = vpack.c.bf16 %v624_v60, %v622_v59  ;;  %v240_v45 = vld [vmem:[#allocation9 + $0x240] sm:$0xff]  ;;  %v242_v46 = vld [vmem:[#allocation9 + $0x250] sm:$0xf]  ;;  %v153_v59 = vld [vmem:[#allocation6 + $0x48] sm:$0xff] }
  0xbd   :  { %1973 = vmatprep.subr.bf16.mxu1 %v1972_v58  ;;  %v2772_v58 = vpack.c.bf16 %v625_v50, %v623_v49  ;;  %v1906_v43 = vpack.c.bf16 %v243_v62, %v241_v61  ;;  %v626_v49 = vld [vmem:[#allocation12 + $0x240] sm:$0xff]  ;;  %v628_v50 = vld [vmem:[#allocation12 + $0x250] sm:$0xf]  ;;  %v157_v61 = vld [vmem:[#allocation6 + $0x68] sm:$0xff] }
  0xbe   :  { %v2800_v57 = vpack.c.bf16 %v628_v50, %v626_v49  ;;  %v527_v60 = vld [vmem:[%s3229_s4 + $0x48] sm:$0xff]  ;;  %v540_v49 = vld [vmem:[%s3229_s4 + $0xb0] sm:$0xff] }
  0xbf   :  { %1897 = vmatpush1.bf16.msra.mxu0 %v1896_v37  ;;  %v629_v37 = vld [vmem:[#allocation12 + $0x258] sm:$0xf]  ;;  %v531_v62 = vld [vmem:[%s3229_s4 + $0x68] sm:$0xff] }
  0xc0   :  { %1975 = vmatpush1.bf16.msra.mxu1 %v1974_v38  ;;  %1899 = vmatprep.subr.bf16.mxu0 %v1898_v39  ;;  %v521_v38 = vld [vmem:[%s3229_s4 + $0x18] sm:$0xff]  ;;  %v165_v50 = vld [vmem:[#allocation6 + $0xa8] sm:$0xff] }
  0xc1   :  { %2094 = vmatprep.subr.bf16.mxu1 %v2761_v42  ;;  %v151_v39 = vld [vmem:[#allocation6 + $0x38] sm:$0xff] }
  0xc2   :  { %341 = vmatmul.mubr.f32.vlgmr.msra.gmra.mrb[0].mxu0 %v144_v47  ;;  %v161_v47 = vld [vmem:[#allocation6 + $0x88] sm:$0xff] }
  0xc3   :  { %737 = vmatmul.mubr.f32.vlgmr.msra.gmra.mrb[0].mxu1 %v518_v51  ;;  %1901 = vmatpush1.bf16.msra.mxu0 %v1900_v48  ;;  %v2789_v48 = vpack.c.bf16 %v629_v37, %v627_v0  ;;  %v150_v51 = vld [vmem:[#allocation6 + $0x30] sm:$0xff]  ;;  %v530_v0 = vld [vmem:[%s3229_s4 + $0x60] sm:$0xff] }
  0xc4   :  { %346 = vmatprep.mubr.f32.mxu0 %v148_v52  ;;  %742 = vmatprep.mubr.f32.mxu1 %v522_v53  ;;  %v524_v52 = vld [vmem:[%s3229_s4 + $0x30] sm:$0xff]  ;;  %v160_v37 = vld [vmem:[#allocation6 + $0x80] sm:$0xff] }
  0xc5   :  { %2097 = vmatpush1.bf16.msra.mxu1 %v2770_v54  ;;  %1903 = vmatprep.subr.bf16.mxu0 %v1902_v55  ;;  %v154_v53 = vld [vmem:[#allocation6 + $0x50] sm:$0xff]  ;;  %v1909_v55 = vpack.c.bf16 %v242_v46, %v240_v45 }
  0xc6   :  { %347 = vmatmul.mubr.f32.gmra.mrb[2].mxu0 %v147_v63  ;;  %2095 = vmatprep.subr.bf16.mxu1 %v2772_v58  ;;  %v156_v63 = vld [vmem:[#allocation6 + $0x60] sm:$0xff]  ;;  %v536_v45 = vld [vmem:[%s3229_s4 + $0x90] sm:$0xff] }
  0xc7   :  { %743 = vmatmul.mubr.f32.gmra.mrb[2].mxu1 %v521_v38  ;;  %352 = vmatprep.mubr.f32.mxu0 %v151_v39  ;;  %v534_v38 = vld [vmem:[%s3229_s4 + $0x80] sm:$0xff]  ;;  %v533_v39 = vld [vmem:[%s3229_s4 + $0x78] sm:$0xff] }
  0xc8   :  { %748 = vmatprep.mubr.f32.mxu1 %v525_v41  ;;  %1905 = vmatpush1.bf16.msra.mxu0 %v1904_v40  ;;  %v163_v40 = vld [vmem:[#allocation6 + $0x98] sm:$0xff]  ;;  %v166_v46 = vld [vmem:[#allocation6 + $0xb0] sm:$0xff] }
  0xc9   :  { %2098 = vmatpush1.bf16.msra.mxu1 %v2781_v44  ;;  %1908 = vmatprep.subr.msk.bf16.mxu0 %vm2785_vm2, %v1906_v43  ;;  %v537_v41 = vld [vmem:[%s3229_s4 + $0x98] sm:$0xff] }
  0xca   :  { %353 = vmatmul.mubr.f32.gmra.mrb[4].mxu0 %v150_v51  ;;  %2096 = vmatprep.subr.msk.bf16.mxu1 %vm2785_vm2, %v2789_v48  ;;  %v162_v43 = vld [vmem:[#allocation6 + $0x90] sm:$0xff]  ;;  %v539_v51 = vld [vmem:[%s3229_s4 + $0xa8] sm:$0xff] }
  0xcb   :  { %749 = vmatmul.mubr.f32.gmra.mrb[4].mxu1 %v524_v52  ;;  %358 = vmatprep.mubr.f32.mxu0 %v154_v53  ;;  %v543_v52 = vld [vmem:[%s3229_s4 + $0xc8] sm:$0xff]  ;;  %v2484_v53 = vmov 0.0  }
  0xcc   :  { %754 = vmatprep.mubr.f32.mxu1 %v528_v56  ;;  %1911 = vmatpush1.bf16.msk.msra.mxu0 %vm2785_vm2, %v1909_v55  ;;  %v146_v55 = vld [vmem:[#allocation6 + $0x10] sm:$0xff]  ;;  %v542_v56 = vld [vmem:[%s3229_s4 + $0xc0] sm:$0xff] }
  0xcd   :  { %1977 = vmatprep.subr.bf16.mxu0 %v2761_v42  ;;  %2099 = vmatpush1.bf16.msk.msra.mxu1 %vm2785_vm2, %v2800_v57  ;;  %v159_v42 = vld [vmem:[#allocation6 + $0x78] sm:$0xff] }
  0xce   :  { %359 = vmatmul.mubr.f32.gmra.mrb[6].mxu0 %v153_v59  ;;  %v546_v59 = vld [vmem:[%s3229_s4 + $0xe0] sm:$0xff] }
  0xcf   :  { %755 = vmatmul.mubr.f32.gmra.mrb[6].mxu1 %v527_v60  ;;  %364 = vmatprep.mubr.f32.mxu0 %v157_v61  ;;  %v149_v60 = vld [vmem:[#allocation6 + $0x28] sm:$0xff]  ;;  %v545_v61 = vld [vmem:[%s3229_s4 + $0xd8] sm:$0xff] }
  0xd0   :  { %760 = vmatprep.mubr.f32.mxu1 %v531_v62  ;;  %v549_v62 = vld [vmem:[%s3229_s4 + $0xf8] sm:$0xff] }
  0xd2   :  { %365 = vmatmul.mubr.f32.gmra.mrb[8].mxu0 %v156_v63  ;;  %v548_v63 = vld [vmem:[%s3229_s4 + $0xf0] sm:$0xff] }
  0xd3   :  { %761 = vmatmul.mubr.f32.gmra.mrb[8].mxu1 %v530_v0  ;;  %370 = vmatprep.mubr.f32.mxu0 %v160_v37  ;;  %v552_v0 = vld [vmem:[%s3229_s4 + $0x110] sm:$0xff]  ;;  %v551_v37 = vld [vmem:[%s3229_s4 + $0x108] sm:$0xff] }
  0xd4   :  { %766 = vmatprep.mubr.f32.mxu1 %v534_v38  ;;  %v164_v38 = vld [vmem:[#allocation6 + $0xa0] sm:$0xff] }
  0xd6   :  { %371 = vmatmul.mubr.f32.gmra.mrb[10].mxu0 %v159_v42  ;;  %v538_v42 = vld [vmem:[%s3229_s4 + $0xa0] sm:$0xff] }
  0xd7   :  { %767 = vmatmul.mubr.f32.gmra.mrb[10].mxu1 %v533_v39  ;;  %376 = vmatprep.mubr.f32.mxu0 %v163_v40  ;;  %v167_v39 = vld [vmem:[#allocation6 + $0xb8] sm:$0xff] }
  0xd8   :  { %772 = vmatprep.mubr.f32.mxu1 %v537_v41  ;;  %v541_v40 = vld [vmem:[%s3229_s4 + $0xb8] sm:$0xff]  ;;  %v520_v41 = vld [vmem:[%s3229_s4 + $0x10] sm:$0xff] }
  0xda   :  { %377 = vmatmul.mubr.f32.gmra.mrb[12].mxu0 %v162_v43  ;;  %v544_v43 = vld [vmem:[%s3229_s4 + $0xd0] sm:$0xff] }
  0xdb   :  { %773 = vmatmul.mubr.f32.gmra.mrb[12].mxu1 %v536_v45  ;;  %382 = vmatprep.mubr.f32.mxu0 %v166_v46  ;;  %v523_v45 = vld [vmem:[%s3229_s4 + $0x28] sm:$0xff] }
  0xdc   :  { %778 = vmatprep.mubr.f32.mxu1 %v540_v49  ;;  %v547_v46 = vld [vmem:[%s3229_s4 + $0xe8] sm:$0xff]  ;;  %v526_v49 = vld [vmem:[%s3229_s4 + $0x40] sm:$0xff] }
  0xde   :  { %383 = vmatmul.mubr.f32.gmra.mrb[14].mxu0 %v165_v50  ;;  %v550_v50 = vld [vmem:[%s3229_s4 + $0x100] sm:$0xff] }
  0xdf   :  { %779 = vmatmul.mubr.f32.gmra.mrb[14].mxu1 %v539_v51  ;;  %453 = vmatprep.mubr.f32.mxu0 %v2484_v53  ;;  %v529_v51 = vld [vmem:[%s3229_s4 + $0x58] sm:$0xff] }
  0xe0   :  { %784 = vmatprep.mubr.f32.mxu1 %v543_v52  ;;  %v553_v52 = vld [vmem:[%s3229_s4 + $0x118] sm:$0xff] }
  0xe2   :  { %1637 = vmatmul.mubr.msk.f32.vlgmr.msra.gmra.mrb[0].mxu0 %vm244_vm3, %v146_v55 }
  0xe3   :  { %785 = vmatmul.mubr.f32.gmra.mrb[16].mxu1 %v542_v56  ;;  %1979 = vmatpush1.bf16.msra.mxu0 %v2770_v54  ;;  %v152_v54 = vld [vmem:[#allocation6 + $0x40] sm:$0xff] }
  0xe4   :  { %459 = vmatprep.mubr.f32.mxu0 %v2484_v53  ;;  %790 = vmatprep.mubr.f32.mxu1 %v546_v59 }
  0xe5   :  { %1981 = vmatprep.subr.bf16.mxu0 %v2772_v58  ;;  %v155_v58 = vld [vmem:[#allocation6 + $0x58] sm:$0xff] }
  0xe6   :  { %1638 = vmatmul.mubr.msk.f32.gmra.mrb[2].mxu0 %vm244_vm3, %v149_v60 }
  0xe7   :  { %791 = vmatmul.mubr.f32.gmra.mrb[18].mxu1 %v545_v61  ;;  %465 = vmatprep.mubr.f32.mxu0 %v2484_v53 }
  0xe8   :  { %796 = vmatprep.mubr.f32.mxu1 %v549_v62  ;;  %1983 = vmatpush1.bf16.msra.mxu0 %v2781_v44  ;;  %v158_v44 = vld [vmem:[#allocation6 + $0x70] sm:$0xff] }
  0xe9   :  { %1986 = vmatprep.subr.msk.bf16.mxu0 %vm2785_vm2, %v2789_v48  ;;  %v532_v48 = vld [vmem:[%s3229_s4 + $0x70] sm:$0xff] }
  0xea   :  { %1639 = vmatmul.mubr.msk.f32.gmra.mrb[4].mxu0 %vm244_vm3, %v152_v54 }
  0xeb   :  { %797 = vmatmul.mubr.f32.gmra.mrb[20].mxu1 %v548_v63  ;;  %471 = vmatprep.mubr.f32.mxu0 %v2484_v53 }
  0xec   :  { %802 = vmatprep.mubr.f32.mxu1 %v552_v0  ;;  %1989 = vmatpush1.bf16.msk.msra.mxu0 %vm2785_vm2, %v2800_v57  ;;  %v535_v57 = vld [vmem:[%s3229_s4 + $0x88] sm:$0xff] }
  0xee   :  { %1640 = vmatmul.mubr.msk.f32.gmra.mrb[6].mxu0 %vm244_vm3, %v155_v58 }
  0xef   :  { %803 = vmatmul.mubr.f32.gmra.mrb[22].mxu1 %v551_v37  ;;  %477 = vmatprep.mubr.f32.mxu0 %v2484_v53 }
  0xf0   :  { %897 = vmatprep.mubr.f32.mxu1 %v2484_v53 }
  0xf2   :  { %1641 = vmatmul.mubr.msk.f32.gmra.mrb[8].mxu0 %vm244_vm3, %v158_v44 }
  0xf3   :  { %1651 = vmatmul.mubr.msk.f32.vlgmr.msra.gmra.mrb[8].mxu1 %vm244_vm3, %v532_v48  ;;  %483 = vmatprep.mubr.f32.mxu0 %v2484_v53 }
  0xf4   :  { %903 = vmatprep.mubr.f32.mxu1 %v2484_v53 }
  0xf6   :  { %1642 = vmatmul.mubr.msk.f32.gmra.mrb[10].mxu0 %vm244_vm3, %v161_v47 }
  0xf7   :  { %1652 = vmatmul.mubr.msk.f32.gmra.mrb[10].mxu1 %vm244_vm3, %v535_v57  ;;  %489 = vmatprep.mubr.f32.mxu0 %v2484_v53 }
  0xf8   :  { %909 = vmatprep.mubr.f32.mxu1 %v2484_v53 }
  0xfa   :  { %1643 = vmatmul.mubr.msk.f32.gmra.mrb[12].mxu0 %vm244_vm3, %v164_v38 }
  0xfb   :  { %1653 = vmatmul.mubr.msk.f32.gmra.mrb[12].mxu1 %vm244_vm3, %v538_v42  ;;  %495 = vmatprep.mubr.f32.mxu0 %v2484_v53 }
  0xfc   :  { %915 = vmatprep.mubr.f32.mxu1 %v2484_v53 }
  0xfe   :  { %1644 = vmatmul.mubr.msk.f32.gmra.mrb[14].mxu0 %vm244_vm3, %v167_v39 }
  0xff   :  { %1654 = vmatmul.mubr.msk.f32.gmra.mrb[14].mxu1 %vm244_vm3, %v541_v40  ;;  %873 = vmatprep.mubr.f32.mxu0 %v2484_v53 }
 0x100   :  { %921 = vmatprep.mubr.f32.mxu1 %v2484_v53 }
 0x102   :  { %1647 = vmatmul.mubr.msk.f32.vlgmr.msra.gmra.mrb[16].mxu0 %vm244_vm3, %v520_v41 }
 0x103   :  { %1655 = vmatmul.mubr.msk.f32.gmra.mrb[16].mxu1 %vm244_vm3, %v544_v43  ;;  %879 = vmatprep.mubr.f32.mxu0 %v2484_v53 }
 0x104   :  { %927 = vmatprep.mubr.f32.mxu1 %v2484_v53 }
 0x106   :  { %1648 = vmatmul.mubr.msk.f32.gmra.mrb[18].mxu0 %vm244_vm3, %v523_v45 }
 0x107   :  { %1656 = vmatmul.mubr.msk.f32.gmra.mrb[18].mxu1 %vm244_vm3, %v547_v46  ;;  %885 = vmatprep.mubr.f32.mxu0 %v2484_v53 }
 0x108   :  { %933 = vmatprep.mubr.f32.mxu1 %v2484_v53 }
 0x10a   :  { %1649 = vmatmul.mubr.msk.f32.gmra.mrb[20].mxu0 %vm244_vm3, %v526_v49 }
 0x10b   :  { %1657 = vmatmul.mubr.msk.f32.gmra.mrb[20].mxu1 %vm244_vm3, %v550_v50  ;;  %891 = vmatprep.mubr.f32.mxu0 %v2484_v53 }
 0x10c   :  { %939 = vmatprep.mubr.f32.mxu1 %v2484_v53 }
 0x10e   :  { %1650 = vmatmul.mubr.msk.f32.gmra.mrb[22].mxu0 %vm244_vm3, %v529_v51 }
 0x10f   :  { %1658 = vmatmul.mubr.msk.f32.gmra.mrb[22].mxu1 %vm244_vm3, %v553_v52 }
 0x196   :  { %v738_v55 = vpop.f32.mrb[0].mxu1 }
 0x197   :  { %v740_v56 = vpop.f32.mrb[1].mxu1 }
 0x19a   :  { %v2947_v59 = vpop.f32.mrb[2].mxu1 }
 0x19b   :  { %v2949_v60 = vpop.f32.mrb[3].mxu1 }
 0x19e   :  { %v2951_v61 = vpop.f32.mrb[4].mxu1 }
 0x19f   :  { %v2953_v62 = vpop.f32.mrb[5].mxu1 }
 0x1a2   :  { %v2955_v54 = vpop.f32.mrb[6].mxu1 }
 0x1a3   :  { %v2957_v63 = vpop.f32.mrb[7].mxu1 }
 0x1b5   :  { %v455_v0 = vpop.f32.mrb[0].mxu0 }
 0x1b6   :  { %502 = vst [vmem:[#allocation2] sm:$0xff] %v455_v0  ;;  %v457_v58 = vpop.f32.mrb[1].mxu0 }
 0x1b7   :  { %503 = vst [vmem:[#allocation2 + $0x8] sm:$0xff] %v457_v58 }
 0x1b9   :  { %v461_v37 = vpop.f32.mrb[2].mxu0 }
 0x1ba   :  { %504 = vst [vmem:[#allocation2 + $0x10] sm:$0xff] %v461_v37  ;;  %v463_v44 = vpop.f32.mrb[3].mxu0 }
 0x1bb   :  { %505 = vst [vmem:[#allocation2 + $0x18] sm:$0xff] %v463_v44 }
 0x1bd   :  { %v467_v48 = vpop.f32.mrb[4].mxu0 }
 0x1be   :  { %506 = vst [vmem:[#allocation2 + $0x20] sm:$0xff] %v467_v48  ;;  %v469_v47 = vpop.f32.mrb[5].mxu0 }
 0x1bf   :  { %507 = vst [vmem:[#allocation2 + $0x28] sm:$0xff] %v469_v47 }
 0x1c1   :  { %v473_v57 = vpop.f32.mrb[6].mxu0 }
 0x1c2   :  { %508 = vst [vmem:[#allocation2 + $0x30] sm:$0xff] %v473_v57  ;;  %v475_v38 = vpop.f32.mrb[7].mxu0 }
 0x1c3   :  { %509 = vst [vmem:[#allocation2 + $0x38] sm:$0xff] %v475_v38 }
 0x1c5   :  { %v479_v42 = vpop.f32.mrb[8].mxu0 }
 0x1c6   :  { %510 = vst [vmem:[#allocation2 + $0x40] sm:$0xff] %v479_v42  ;;  %v899_v39 = vpop.f32.mrb[8].mxu1  ;;  %v481_v40 = vpop.f32.mrb[9].mxu0 }
 0x1c7   :  { %954 = vst [vmem:[#allocation3 + $0x40] sm:$0xff] %v899_v39  ;;  %511 = vst [vmem:[#allocation2 + $0x48] sm:$0xff] %v481_v40  ;;  %v901_v41 = vpop.f32.mrb[9].mxu1 }
 0x1c8   :  { %955 = vst [vmem:[#allocation3 + $0x48] sm:$0xff] %v901_v41 }
 0x1c9   :  { %v485_v43 = vpop.f32.mrb[10].mxu0 }
 0x1ca   :  { %512 = vst [vmem:[#allocation2 + $0x50] sm:$0xff] %v485_v43  ;;  %v905_v45 = vpop.f32.mrb[10].mxu1  ;;  %v487_v46 = vpop.f32.mrb[11].mxu0 }
 0x1cb   :  { %956 = vst [vmem:[#allocation3 + $0x50] sm:$0xff] %v905_v45  ;;  %513 = vst [vmem:[#allocation2 + $0x58] sm:$0xff] %v487_v46  ;;  %v907_v49 = vpop.f32.mrb[11].mxu1 }
 0x1cc   :  { %957 = vst [vmem:[#allocation3 + $0x58] sm:$0xff] %v907_v49 }
 0x1cd   :  { %v491_v50 = vpop.f32.mrb[12].mxu0 }
 0x1ce   :  { %514 = vst [vmem:[#allocation2 + $0x60] sm:$0xff] %v491_v50  ;;  %v911_v51 = vpop.f32.mrb[12].mxu1  ;;  %v493_v52 = vpop.f32.mrb[13].mxu0 }
 0x1cf   :  { %958 = vst [vmem:[#allocation3 + $0x60] sm:$0xff] %v911_v51  ;;  %515 = vst [vmem:[#allocation2 + $0x68] sm:$0xff] %v493_v52  ;;  %v913_v0 = vpop.f32.mrb[13].mxu1 }
 0x1d0   :  { %959 = vst [vmem:[#allocation3 + $0x68] sm:$0xff] %v913_v0 }
 0x1d1   :  { %v497_v58 = vpop.f32.mrb[14].mxu0 }
 0x1d2   :  { %516 = vst [vmem:[#allocation2 + $0x70] sm:$0xff] %v497_v58  ;;  %v917_v37 = vpop.f32.mrb[14].mxu1  ;;  %v499_v44 = vpop.f32.mrb[15].mxu0 }
 0x1d3   :  { %960 = vst [vmem:[#allocation3 + $0x70] sm:$0xff] %v917_v37  ;;  %517 = vst [vmem:[#allocation2 + $0x78] sm:$0xff] %v499_v44  ;;  %v919_v48 = vpop.f32.mrb[15].mxu1 }
 0x1d4   :  { %961 = vst [vmem:[#allocation3 + $0x78] sm:$0xff] %v919_v48 }
 0x1d5   :  { %v875_v47 = vpop.f32.mrb[16].mxu0 }
 0x1d6   :  { %v876_v57 = vadd.f32 %v875_v47, %v738_v55  ;;  %v923_v38 = vpop.f32.mrb[16].mxu1  ;;  %v877_v42 = vpop.f32.mrb[17].mxu0 }
 0x1d7   :  { %962 = vst [vmem:[#allocation3 + $0x80] sm:$0xff] %v923_v38  ;;  %v878_v39 = vadd.f32 %v877_v42, %v740_v56  ;;  %v925_v40 = vpop.f32.mrb[17].mxu1  ;;  %v2976_v38 = vmov (!%p1659_p6), 0.0  }
 0x1d8   :  { %946 = vst [vmem:[#allocation3] sm:$0xff] %v876_v57  ;;  %963 = vst [vmem:[#allocation3 + $0x88] sm:$0xff] %v925_v40  ;;  %v2972_v57 = vmov (!%p1659_p6), 0.0  }
 0x1d9   :  { %947 = vst [vmem:[#allocation3 + $0x8] sm:$0xff] %v878_v39  ;;  %v881_v41 = vpop.f32.mrb[18].mxu0 }
 0x1da   :  { %v882_v43 = vadd.f32 %v881_v41, %v2947_v59  ;;  %v929_v45 = vpop.f32.mrb[18].mxu1  ;;  %v883_v46 = vpop.f32.mrb[19].mxu0 }
 0x1db   :  { %964 = vst [vmem:[#allocation3 + $0x90] sm:$0xff] %v929_v45  ;;  %v884_v49 = vadd.f32 %v883_v46, %v2949_v60  ;;  %v931_v50 = vpop.f32.mrb[19].mxu1 }
 0x1dc   :  { %948 = vst [vmem:[#allocation3 + $0x10] sm:$0xff] %v882_v43  ;;  %965 = vst [vmem:[#allocation3 + $0x98] sm:$0xff] %v931_v50 }
 0x1dd   :  { %949 = vst [vmem:[#allocation3 + $0x18] sm:$0xff] %v884_v49  ;;  %v887_v55 = vpop.f32.mrb[20].mxu0 }
 0x1de   :  { %v888_v51 = vadd.f32 %v887_v55, %v2951_v61  ;;  %v935_v56 = vpop.f32.mrb[20].mxu1  ;;  %v889_v52 = vpop.f32.mrb[21].mxu0  ;;  %v2968_v61 = vmov 0.0  }
 0x1df   :  { %966 = vst [vmem:[#allocation3 + $0xa0] sm:$0xff] %v935_v56  ;;  %v890_v0 = vadd.f32 %v889_v52, %v2953_v62  ;;  %v937_v58 = vpop.f32.mrb[21].mxu1  ;;  %v2970_v62 = vmov 0.0   ;;  %1624 = sbr.rel (%p1659_p6) target bundleno = 985 (0x3d9), region = 123 }
 0x1e0   :  { %950 = vst [vmem:[#allocation3 + $0x20] sm:$0xff] %v888_v51  ;;  %967 = vst [vmem:[#allocation3 + $0xa8] sm:$0xff] %v937_v58 }
 0x1e1   :  { %951 = vst [vmem:[#allocation3 + $0x28] sm:$0xff] %v890_v0  ;;  %v893_v59 = vpop.f32.mrb[22].mxu0 }
 0x1e2   :  { %v894_v37 = vadd.f32 %v893_v59, %v2955_v54  ;;  %v941_v60 = vpop.f32.mrb[22].mxu1  ;;  %v895_v44 = vpop.f32.mrb[23].mxu0  ;;  %v2974_v54 = vmov (!%p1659_p6), 0.0  }
 0x1e3   :  { %968 = vst [vmem:[#allocation3 + $0xb0] sm:$0xff] %v941_v60  ;;  %v896_v48 = vadd.f32 %v895_v44, %v2957_v63  ;;  %v943_v47 = vpop.f32.mrb[23].mxu1  ;;  %v2978_v63 = vmov (!%p1659_p6), 0.0  }
 0x1e4   :  { %952 = vst [vmem:[#allocation3 + $0x30] sm:$0xff] %v894_v37  ;;  %969 = vst [vmem:[#allocation3 + $0xb8] sm:$0xff] %v943_v47 }
 0x1e5   :  { %953 = vst [vmem:[#allocation3 + $0x38] sm:$0xff] %v896_v48 }
 0x1e6 LB: > { %v1990_v42 = vpack.c.bf16 %v2700_v8, %v2696_v6  ;;  %v1992_v39 = vpack.c.bf16 %v2698_v7, %v2694_v5  ;;  %v1994_v40 = vpack.c.bf16 %v2708_v12, %v2704_v10  ;;  %v2006_v41 = vpack.c.bf16 %v2732_v24, %v2728_v22  ;;  %s2485_s22 = smov 64   ;;  %p1017_p7 = scmp.lt.s32.totalorder %s2461_s21, 7  ;;  %s2461_s21 = sphi %s2980_s21, %s1010_s21   ;;  %v2457_v63 = vphi %v2978_v63, %v3254_v63   ;;  %v2453_v38 = vphi %v2976_v38, %v1273_v38   ;;  %v2449_v54 = vphi %v2974_v54, %v3253_v54   ;;  %v2445_v57 = vphi %v2972_v57, %v1280_v57  }
 0x1e7   : > { %1031 = vrot.lane.b32.xlu0 %v2457_v63, %s2485_s22  ;;  %v2008_v43 = vpack.c.bf16 %v2730_v23, %v2726_v21  ;;  %v1996_v45 = vpack.c.bf16 %v2706_v11, %v2702_v9  ;;  %v2010_v46 = vpack.c.bf16 %v2740_v28, %v2736_v26  ;;  %v1998_v49 = vpack.c.bf16 %v2716_v16, %v2712_v14  ;;  %p1020_p8 = scmp.lt.s32.totalorder %s2461_s21, 11  ;;  %s3252_s27 = sld [smem:[#allocation23_spill]] }
 0x1e8   : > { %1991 = vmatprep.subr.bf16.mxu0 %v1990_v42  ;;  %2007 = vmatprep.subr.bf16.mxu1 %v2006_v41  ;;  %v2012_v50 = vpack.c.bf16 %v2738_v27, %v2734_v25  ;;  %v2014_v55 = vpack.c.bf16 %v2748_v32, %v2744_v30  ;;  %v2486_v51 = vmov 0.0   ;;  %v2000_v56 = vpack.c.bf16 %v2714_v15, %v2710_v13  ;;  %s1018_s3 = scalar_select %p1017_p7, %s2461_s21, 7 }
 0x1e9   : > { %1993 = vmatpush1.bf16.msra.mxu0 %v1992_v39  ;;  %2009 = vmatpush1.bf16.msra.mxu1 %v2008_v43  ;;  %v2002_v52 = vpack.c.bf16 %v2724_v20, %v2720_v18  ;;  %v2016_v0 = vpack.c.bf16 %v2746_v31, %v2742_v29  ;;  %v2018_v58 = vpack.c.bf16 %v2756_v36, %v2752_v34  ;;  %vm1033_vm4 = vcmask 523264   ;;  %s1021_s8 = scalar_select %p1020_p8, %s2461_s21, 11 }
 0x1ea   : > { %1995 = vmatprep.subr.bf16.mxu0 %v1994_v40  ;;  %2011 = vmatprep.subr.bf16.mxu1 %v2010_v46  ;;  %v2004_v59 = vpack.c.bf16 %v2722_v19, %v2718_v17  ;;  %v2020_v37 = vpack.c.bf16 %v2754_v35, %v2750_v33  ;;  %v1264_v48 = vstv %s2461_s21  ;;  %v2487_v47 = vmov 0   ;;  %s1660_s0 = sshll.u32 %s1018_s3, 3  ;;  %s1010_s21 = sadd.s32 1, %s2461_s21  }
 0x1eb   : > { %1100 = vmatprep.mubr.f32.mxu0 %v2486_v51  ;;  %1130 = vrot.lane.b32.xlu0 %v2449_v54, %s2485_s22  ;;  %vm1265_vm5 = vcmp.lt.s32.totalorder %v1264_v48, %v2677_v1  ;;  %vm1266_vm6 = vcmp.lt.s32.totalorder %v1264_v48, %v2682_v2  ;;  %v1110_v42 = vlaneseq  ;;  %s1023_s28 = sshra.s32 %s1660_s0, 3  ;;  %s1661_s2 = sshll.u32 %s1021_s8, 3 }
 0x1ec   : > { %1198 = vmatprep.mubr.f32.mxu1 %v2486_v51  ;;  %2217 = vset.pattern.permute.xlu0 %v2487_v47  ;;  %v1267_v61 = vsel %vm1265_vm5, 1, %v2487_v47  ;;  %v1274_v62 = vsel %vm1266_vm6, 1, %v2487_v47  ;;  %s1676_s16 = sshll.u32 %s1023_s28, 4  ;;  %s1122_s9 = sshra.s32 %s1661_s2, 3 }
 0x1ed   : > { %1997 = vmatpush1.bf16.msra.mxu0 %v1996_v45  ;;  %2013 = vmatpush1.bf16.msra.mxu1 %v2012_v50  ;;  %v1111_v39 = vshrl.u32 %v1110_v42, 7  ;;  %s1677_s23 = sshll.u32 %s1122_s9, 4  ;;  %s1027_s24 = scalar_lea.vmem [#allocation2], %s1676_s16 }
 0x1ee   : > { %1999 = vmatprep.subr.bf16.mxu0 %v1998_v49  ;;  %2015 = vmatprep.subr.bf16.mxu1 %v2014_v55  ;;  %v1028_v41 = vld [vmem:[%s1027_s24] sm:$0xff]  ;;  %s1126_s26 = scalar_lea.vmem [#allocation3], %s1677_s23  ;;  %p1009_p9 = scmp.ge.s32.totalorder %s1010_s21, %s3252_s27 }
 0x1ef   : > { %2218 = vset.pattern.permute.xlu1 %v2487_v47  ;;  %1269 = vperm.xlu0 %2217, %v1267_v61   ;;  %v1112_v40 = vsub.s32 0, %v1111_v39  ;;  %v1127_v50 = vld [vmem:[%s1126_s26] sm:$0xff]  ;;  %v1128_v61 = vld [vmem:[%s1126_s26 + $0x8] sm:$0xff] }
 0x1f1   : > { %2001 = vmatpush1.bf16.msra.mxu0 %v2000_v56  ;;  %2017 = vmatpush1.bf16.msra.mxu1 %v2016_v0  ;;  %v1113_v43 = vrot.slane %v2687_v3, %v1112_v40  ;;  %v1211_v51 = vrot.slane %v2692_v4, %v1112_v40 }
 0x1f2   : > { %2003 = vmatprep.subr.bf16.mxu0 %v2002_v52  ;;  %2019 = vmatprep.subr.bf16.mxu1 %v2018_v58 }
 0x1f5   : > { %2005 = vmatpush1.bf16.msra.mxu0 %v2004_v59  ;;  %2021 = vmatpush1.bf16.msra.mxu1 %v2020_v37  ;;  %v1116_v59 = vsub.s32 1, %v1111_v39 }
 0x1f7   : > { %v1117_v47 = vrot.slane %v2687_v3, %v1116_v59 }
 0x259   : > { %v1032_v60 = vpop.permute.xlu0 %1031 }
 0x25a   : > { %1664 = vmatmul.mubr.msk.f32.vlgmr.msra.gmra.mrb[0].mxu0 %vm1033_vm4, %v1032_v60  ;;  %v1029_v60 = vld [vmem:[%s1027_s24 + $0x8] sm:$0xff] }
 0x25d   : > { %v1131_v44 = vpop.permute.xlu0 %1130 }
 0x25e   : > { %1667 = vmatmul.mubr.msk.f32.vlgmr.msra.gmra.mrb[0].mxu1 %vm1033_vm4, %v1131_v44 }
 0x32d   : > { %v1102_v45 = vpop.f32.mrb[0].mxu0 }
 0x32e   : > { %v1107_v46 = vadd.f32 %v1102_v45, %v1028_v41  ;;  %v1104_v49 = vpop.f32.mrb[1].mxu0 }
 0x32f   : > { %v1108_v48 = vadd.f32 %v1104_v49, %v1029_v60  ;;  %v1270_v60 = vpop.permute.xlu0 %1269 }
 0x330   : > { %v1120_v55 = vadd.f32 %v1113_v43, %v1107_v46  ;;  %v1215_v43 = vrot.slane %v2692_v4, %v1116_v59  ;;  %vm1271_vm7 = vcmp.eq.s32.totalorder %v1270_v60, 1 }
 0x331   : > { %v1200_v56 = vpop.f32.mrb[0].mxu1  ;;  %v1121_v42 = vadd.f32 %v1117_v47, %v1108_v48 }
 0x332   : > { %v1668_v52 = vmul.f32 -1.442695, %v1120_v55  ;;  %v1205_v0 = vadd.f32 %v1200_v56, %v1127_v50  ;;  %v1202_v58 = vpop.f32.mrb[1].mxu1 }
 0x333   : > { %v1206_v41 = vadd.f32 %v1202_v58, %v1128_v61  ;;  %v1669_v58 = vmul.f32 -1.442695, %v1121_v42 }
 0x334   : > { %2219 = vpow2.f32 %v1668_v52  ;;  %v1218_v37 = vadd.f32 %v1211_v51, %v1205_v0 }
 0x335   : > { %v1219_v46 = vadd.f32 %v1215_v43, %v1206_v41 }
 0x336   : > { %v1670_v44 = vmul.f32 -1.442695, %v1218_v37 }
 0x337   : > { %v1671_v59 = vmul.f32 -1.442695, %v1219_v46 }
 0x338   : > { %2221 = vpow2.f32 %v1670_v44 }
 0x339   : > { %2223 = vtanh.f32 %v1121_v42 }
 0x33e   : > { %v2220_v45 = vpop.eup %2219 }
 0x33f   : > { %v1223_v40 = vadd.f32 1.0, %v2220_v45 }
 0x341   : > { %2225 = vrcp.f32 %v1223_v40 }
 0x342   : > { %v2222_v50 = vpop.eup %2221  ;;  %2227 = vtanh.f32 %v1219_v46 }
 0x343   : > { %v1245_v55 = vadd.f32 1.0, %v2222_v50  ;;  %v2224_v39 = vpop.eup %2223 }
 0x345   : > { %2229 = vrcp.f32 %v1245_v55 }
 0x346   : > { %2231 = vpow2.f32 %v1669_v58 }
 0x347   : > { %2233 = vpow2.f32 %v1671_v59 }
 0x34b   : > { %v2226_v51 = vpop.eup %2225 }
 0x34c   : > { %v1234_v49 = vmul.f32 %v2226_v51, %v2224_v39  ;;  %v2228_v56 = vpop.eup %2227  ;;  %v1233_v47 = vmul.f32 %v2453_v38, %v2226_v51 }
 0x34e   : > { %1236 = vrot.lane.b32.xlu1 %v1234_v49, %s2485_s22 }
 0x34f   : > { %v2230_v52 = vpop.eup %2229 }
 0x350   : > { %v1256_v0 = vmul.f32 %v2230_v52, %v2228_v56  ;;  %v2232_v37 = vpop.eup %2231 }
 0x351   : > { %v1230_v44 = vadd.f32 1.0, %v2232_v37  ;;  %v2234_v48 = vpop.eup %2233 }
 0x352   : > { %1258 = vrot.lane.b32.xlu1 %v1256_v0, %s2485_s22  ;;  %v1252_v43 = vadd.f32 1.0, %v2234_v48 }
 0x353   : > { %2235 = vrcp.f32 %v1230_v44 }
 0x356   : > { %1276 = vperm.xlu1 %2218, %v1274_v62   ;;  %v1255_v62 = vmul.f32 %v2445_v57, %v2230_v52 }
 0x35d   : > { %v2236_v40 = vpop.eup %2235 }
 0x3c0   : > { %v1237_v61 = vpop.permute.xlu1 %1236 }
 0x3c1   : > { %v1239_v41 = vadd.f32 %v1237_v61, %v1233_v47 }
 0x3c3   : > { %2237 = vtanh.f32 %v1239_v41  ;;  %v1273_v38 = vsel %vm1271_vm7, %v1239_v41, %v2453_v38  }
 0x3c4   : > { %v1259_v42 = vpop.permute.xlu1 %1258  ;;  %2239 = vrcp.f32 %v1252_v43 }
 0x3c5   : > { %v1261_v45 = vadd.f32 %v1259_v42, %v1255_v62 }
 0x3c7   : > { %2241 = vtanh.f32 %v1261_v45 }
 0x3cd   : > { %v2238_v46 = vpop.eup %2237 }
 0x3ce   : > { %v1241_v50 = vmul.f32 %v2238_v46, %v2236_v40  ;;  %v2240_v55 = vpop.eup %2239 }
 0x3d0   : > { %v1272_v39 = vsel %vm1271_vm7, %v1241_v50, %v2457_v63  }
 0x3d1   : > { %v2242_v51 = vpop.eup %2241  ;;  %v3254_v63 = vmov %v1272_v39  ;;  %v3256_v62 = vmov (%p1009_p9), %v1272_v39 }
 0x3d2   : > { %v1263_v49 = vmul.f32 %v2242_v51, %v2240_v55  ;;  %1012 = sbr.rel (!%p1009_p9) target bundleno = 486 (0x1e6), region = 129 }
 0x3d5   : > { %v1277_v56 = vpop.permute.xlu1 %1276 }
 0x3d6   : > { %vm1278_vm8 = vcmp.eq.s32.totalorder %v1277_v56, 1 }
 0x3d7   : > { %v1279_v0 = vsel %vm1278_vm8, %v1263_v49, %v2449_v54   ;;  %v1280_v57 = vsel %vm1278_vm8, %v1261_v45, %v2445_v57  }
 0x3d8   : > { %v3253_v54 = vmov %v1279_v0  ;;  %v3255_v61 = vmov (%p1009_p9), %v1279_v0 }
 0x3d9 PF:  { %v1281_v63 = vmax.f32 %v2469_v62, 0.0  ;;  %v1289_v52 = vld [vmem:[#allocation15] sm:$0xff]  ;;  %v1290_v58 = vld [vmem:[#allocation15 + $0x8] sm:$0xff]  ;;  %v1291_v59 = vld [vmem:[#allocation15 + $0x10] sm:$0xff]  ;;  %v2488_v37 = vmov 0.0|0.0   ;;  %s2489_s29 = smov 64   ;;  %v2469_v62 = vphi %v2970_v62, %v3256_v62   ;;  %v2465_v61 = vphi %v2968_v61, %v3255_v61  }
 0x3da   :  { %2022 = vmatprep.subr.bf16.mxu0 %v2488_v37  ;;  %v2023_v60 = vpack.c.bf16 %v1290_v58, %v1289_v52  ;;  %v1292_v44 = vld [vmem:[#allocation15 + $0x18] sm:$0xff]  ;;  %2046 = vmatprep.subr.bf16.mxu1 %v2488_v37  ;;  %vm2490_vm9 = vmmov 0   ;;  %v1293_v2 = vld [vmem:[#allocation15 + $0x20] sm:$0xff]  ;;  %v1294_v3 = vld [vmem:[#allocation15 + $0x28] sm:$0xff]  ;;  %v1282_v43 = vmax.f32 %v2465_v61, 0.0  ;;  %vm1287_vm10 = vcmask 523264  }
 0x3db   :  { %1284 = vrot.lane.b32.xlu0 %v1281_v63, %s2489_s29  ;;  %1761 = vmatprep.mubr.msk.f32.mxu0 %vm2490_vm9, %v2484_v53  ;;  %v2026_v1 = vpack.c.bf16 %v1292_v44, %v1291_v59  ;;  %v1383_v4 = vld [vmem:[%s3238_s13] sm:$0xff]  ;;  %v1384_v5 = vld [vmem:[%s3238_s13 + $0x8] sm:$0xff]  ;;  %v1385_v7 = vld [vmem:[%s3238_s13 + $0x10] sm:$0xff]  ;;  %v2029_v8 = vpack.c.bf16 %v1294_v3, %v1293_v2  ;;  %vm1476_vm11 = vcmask 39936   ;;  %vm1590_vm12 = vcmask 7168  }
 0x3dc   :  { %2024 = vmatpush3.bf16.msra.mxu0 %v2023_v60  ;;  %1796 = vmatprep.mubr.msk.f32.mxu1 %vm2490_vm9, %v2484_v53  ;;  %v2047_v6 = vpack.c.bf16 %v1384_v5, %v1383_v4  ;;  %v1386_v9 = vld [vmem:[%s3238_s13 + $0x18] sm:$0xff]  ;;  %v1387_v13 = vld [vmem:[%s3238_s13 + $0x20] sm:$0xff]  ;;  %v1388_v14 = vld [vmem:[%s3238_s13 + $0x28] sm:$0xff] }
 0x3dd   :  { %2025 = vmatprep.subr.bf16.mxu0 %v2488_v37  ;;  %v1295_v10 = vld [vmem:[#allocation15 + $0x30] sm:$0xff]  ;;  %v1296_v11 = vld [vmem:[#allocation15 + $0x38] sm:$0xff]  ;;  %v2050_v12 = vpack.c.bf16 %v1386_v9, %v1385_v7  ;;  %v1297_v16 = vld [vmem:[#allocation15 + $0x40] sm:$0xff]  ;;  %v2053_v18 = vpack.c.bf16 %v1388_v14, %v1387_v13 }
 0x3de   :  { %2048 = vmatpush3.bf16.msra.mxu1 %v2047_v6  ;;  %v2032_v15 = vpack.c.bf16 %v1296_v11, %v1295_v10  ;;  %v1298_v17 = vld [vmem:[#allocation15 + $0x48] sm:$0xff]  ;;  %v1390_v20 = vld [vmem:[%s3238_s13 + $0x38] sm:$0xff]  ;;  %v1391_v25 = vld [vmem:[%s3238_s13 + $0x40] sm:$0xff] }
 0x3df   :  { %2049 = vmatprep.subr.bf16.mxu1 %v2488_v37  ;;  %v1389_v19 = vld [vmem:[%s3238_s13 + $0x30] sm:$0xff]  ;;  %v2035_v21 = vpack.c.bf16 %v1298_v17, %v1297_v16  ;;  %v1300_v23 = vld [vmem:[#allocation15 + $0x58] sm:$0xff]  ;;  %v1392_v26 = vld [vmem:[%s3238_s13 + $0x48] sm:$0xff] }
 0x3e0   :  { %2027 = vmatpush3.bf16.msra.mxu0 %v2026_v1  ;;  %v1299_v22 = vld [vmem:[#allocation15 + $0x50] sm:$0xff]  ;;  %v2056_v24 = vpack.c.bf16 %v1390_v20, %v1389_v19  ;;  %v1301_v28 = vld [vmem:[#allocation15 + $0x60] sm:$0xff]  ;;  %v1302_v29 = vld [vmem:[#allocation15 + $0x68] sm:$0xff]  ;;  %v2059_v30 = vpack.c.bf16 %v1392_v26, %v1391_v25 }
 0x3e1   :  { %2028 = vmatprep.subr.bf16.mxu0 %v2488_v37  ;;  %v2038_v27 = vpack.c.bf16 %v1300_v23, %v1299_v22  ;;  %v1393_v31 = vld [vmem:[%s3238_s13 + $0x50] sm:$0xff]  ;;  %v1394_v32 = vld [vmem:[%s3238_s13 + $0x58] sm:$0xff]  ;;  %v2041_v33 = vpack.c.bf16 %v1302_v29, %v1301_v28  ;;  %v1395_v57 = vld [vmem:[%s3238_s13 + $0x60] sm:$0xff] }
 0x3e2   :  { %2051 = vmatpush3.bf16.msra.mxu1 %v2050_v12  ;;  %v1303_v34 = vld [vmem:[#allocation15 + $0x70] sm:$0xff]  ;;  %v1304_v35 = vld [vmem:[#allocation15 + $0x78] sm:$0xff]  ;;  %v2062_v36 = vpack.c.bf16 %v1394_v32, %v1393_v31  ;;  %v1396_v54 = vld [vmem:[%s3238_s13 + $0x68] sm:$0xff] }
 0x3e3   :  { %2052 = vmatprep.subr.bf16.mxu1 %v2488_v37  ;;  %v2044_v38 = vpack.c.bf16 %v1304_v35, %v1303_v34  ;;  %v2065_v48 = vpack.c.bf16 %v1396_v54, %v1395_v57  ;;  %v1491_v47 = vld [vmem:[%s3240_s15] sm:$0xff]  ;;  %v1492_v41 = vld [vmem:[%s3240_s15 + $0x8] sm:$0xff]  ;;  %v1493_v45 = vld [vmem:[%s3240_s15 + $0x10] sm:$0xff] }
 0x3e4   :  { %2030 = vmatpush3.bf16.msra.mxu0 %v2029_v8  ;;  %v2071_v62 = vpack.c.bf16 %v1492_v41, %v1491_v47  ;;  %v1494_v40 = vld [vmem:[%s3240_s15 + $0x18] sm:$0xff]  ;;  %v1495_v61 = vld [vmem:[%s3240_s15 + $0x20] sm:$0xff]  ;;  %v1496_v55 = vld [vmem:[%s3240_s15 + $0x28] sm:$0xff] }
 0x3e5   :  { %2031 = vmatprep.subr.bf16.mxu0 %v2488_v37  ;;  %v2074_v50 = vpack.c.bf16 %v1494_v40, %v1493_v45  ;;  %v2077_v39 = vpack.c.bf16 %v1496_v55, %v1495_v61  ;;  %v1497_v51 = vld [vmem:[%s3240_s15 + $0x30] sm:$0xff]  ;;  %v1499_v56 = vld [vmem:[%s3240_s15 + $0x40] sm:$0xff]  ;;  %v1500_v0 = vld [vmem:[%s3240_s15 + $0x48] sm:$0xff] }
 0x3e6   :  { %2054 = vmatpush3.bf16.msra.mxu1 %v2053_v18  ;;  %v2083_v63 = vpack.c.bf16 %v1500_v0, %v1499_v56  ;;  %v1501_v52 = vld [vmem:[%s3240_s15 + $0x50] sm:$0xff]  ;;  %v1502_v58 = vld [vmem:[%s3240_s15 + $0x58] sm:$0xff]  ;;  %v1503_v60 = vld [vmem:[%s3240_s15 + $0x60] sm:$0xff] }
 0x3e7   :  { %2055 = vmatprep.subr.bf16.mxu1 %v2488_v37  ;;  %v2086_v59 = vpack.c.bf16 %v1502_v58, %v1501_v52  ;;  %v1504_v44 = vld [vmem:[%s3240_s15 + $0x68] sm:$0xff]  ;;  %v1397_v2 = vld [vmem:[%s3238_s13 + $0x70] sm:$0xff]  ;;  %v1398_v3 = vld [vmem:[%s3238_s13 + $0x78] sm:$0xff] }
 0x3e8   :  { %2033 = vmatpush3.bf16.msra.mxu0 %v2032_v15  ;;  %v2089_v1 = vpack.c.bf16 %v1504_v44, %v1503_v60  ;;  %v1505_v4 = vld [vmem:[%s3240_s15 + $0x70] sm:$0xff]  ;;  %v2068_v5 = vpack.c.bf16 %v1398_v3, %v1397_v2  ;;  %v1506_v6 = vld [vmem:[%s3240_s15 + $0x78] sm:$0xff]  ;;  %v1673_v12 = vld [vmem:[%s3239_s14] ss:$0 sm:$0xff] }
 0x3e9   :  { %2034 = vmatprep.subr.bf16.mxu0 %v2488_v37  ;;  %v2092_v7 = vpack.c.bf16 %v1506_v6, %v1505_v4  ;;  %v1674_v13 = vld [vmem:[#allocation5] ss:$0 sm:$0xff] }
 0x3ea   :  { %2057 = vmatpush3.bf16.msra.mxu1 %v2056_v24 }
 0x3eb   :  { %2058 = vmatprep.subr.bf16.mxu1 %v2488_v37 }
 0x3ec   :  { %2036 = vmatpush3.bf16.msra.mxu0 %v2035_v21 }
 0x3ed   :  { %2037 = vmatprep.subr.bf16.mxu0 %v2488_v37 }
 0x3ee   :  { %2060 = vmatpush3.bf16.msra.mxu1 %v2059_v30 }
 0x3ef   :  { %2061 = vmatprep.subr.bf16.mxu1 %v2488_v37 }
 0x3f0   :  { %2039 = vmatpush3.bf16.msra.mxu0 %v2038_v27 }
 0x3f1   :  { %2040 = vmatprep.subr.bf16.mxu0 %v2488_v37 }
 0x3f2   :  { %2063 = vmatpush3.bf16.msra.mxu1 %v2062_v36 }
 0x3f3   :  { %2064 = vmatprep.subr.bf16.mxu1 %v2488_v37 }
 0x3f4   :  { %2042 = vmatpush3.bf16.msra.mxu0 %v2041_v33 }
 0x3f5   :  { %2043 = vmatprep.subr.bf16.mxu0 %v2488_v37 }
 0x3f6   :  { %2066 = vmatpush3.bf16.msra.mxu1 %v2065_v48 }
 0x3f7   :  { %2067 = vmatprep.subr.bf16.mxu1 %v2488_v37 }
 0x3f8   :  { %2045 = vmatpush3.bf16.msra.mxu0 %v2044_v38 }
 0x3f9   :  { %2070 = vmatprep.subr.bf16.mxu0 %v2488_v37 }
 0x3fa   :  { %2069 = vmatpush3.bf16.msra.mxu1 %v2068_v5 }
 0x44d   :  { %v1285_v42 = vpop.permute.xlu0 %1284 }
 0x44e   :  { %v1288_v46 = vsel %vm1287_vm10, %v1285_v42, %v1282_v43 }
 0x44f   :  { %1762 = vmatmul.mubr.f32.vlgmr.msra.gmra.mrb[0].mxu0 %v1288_v46 }
 0x450   :  { %2072 = vmatpush3.bf16.msra.mxu0 %v2071_v62  ;;  %1831 = vmatprep.mubr.msk.f32.mxu0 %vm2490_vm9, %v2484_v53  ;;  %v1498_v53 = vld [vmem:[%s3240_s15 + $0x38] sm:$0xff]  ;;  %s2491_s15 = smov [#allocation17]  }
 0x451   :  { %2073 = vmatprep.subr.bf16.mxu0 %v2488_v37  ;;  %v2080_v49 = vpack.c.bf16 %v1498_v53, %v1497_v51  ;;  %s1598_s9 = sshll.u32 %s2491_s15, 4  ;;  %s1599_s9 = int_to_ptr.vmem [resolvable:$true] %s1598_s9 }
 0x452   :  { %p2388_p11 = scmp.lt.s32.totalorder %s1599_s9, %s1599_s9 }
 0x454   :  { %2075 = vmatpush3.bf16.msra.mxu0 %v2074_v50 }
 0x455   :  { %2076 = vmatprep.subr.bf16.mxu0 %v2488_v37 }
 0x458   :  { %2078 = vmatpush3.bf16.msra.mxu0 %v2077_v39 }
 0x459   :  { %2079 = vmatprep.subr.bf16.mxu0 %v2488_v37 }
 0x45c   :  { %2081 = vmatpush3.bf16.msra.mxu0 %v2080_v49 }
 0x45d   :  { %2082 = vmatprep.subr.bf16.mxu0 %v2488_v37 }
 0x460   :  { %2084 = vmatpush3.bf16.msra.mxu0 %v2083_v63 }
 0x461   :  { %2085 = vmatprep.subr.bf16.mxu0 %v2488_v37 }
 0x464   :  { %2087 = vmatpush3.bf16.msra.mxu0 %v2086_v59 }
 0x465   :  { %2088 = vmatprep.subr.bf16.mxu0 %v2488_v37 }
 0x468   :  { %2090 = vmatpush3.bf16.msra.mxu0 %v2089_v1 }
 0x469   :  { %2091 = vmatprep.subr.bf16.mxu0 %v2488_v37  ;;  %v1672_v37 = vld [vmem:[%s3237_s12] ss:$0 sm:$0xff] }
 0x46c   :  { %2093 = vmatpush3.bf16.msra.mxu0 %v2092_v7 }
 0x522   :  { %v1378_v8 = vpop.f32.mrb[0].mxu0 }
 0x523   :  { %v1379_v9 = vadd.f32 %v1672_v37, %v1378_v8  ;;  %v1763_v10 = vpop.f32.mrb[1].mxu0 }
 0x525   :  { %v1382_v11 = vmax.f32 %v1379_v9, 0.0 }
 0x527   :  { %1797 = vmatmul.mubr.f32.vlgmr.msra.gmra.mrb[0].mxu1 %v1382_v11  ;;  %1832 = vmatmul.mubr.f32.vlgmr.msra.gmra.mrb[2].mxu0 %v1382_v11 }
 0x5fa   :  { %v1472_v14 = vpop.f32.mrb[0].mxu1  ;;  %v1580_v15 = vpop.f32.mrb[2].mxu0 }
 0x5fb   :  { %v1473_v16 = vadd.f32 %v1673_v12, %v1472_v14  ;;  %v1581_v17 = vadd.f32 %v1674_v13, %v1580_v15  ;;  %v1798_v18 = vpop.f32.mrb[1].mxu1  ;;  %v1833_v19 = vpop.f32.mrb[3].mxu0 }
 0x5fd   :  { %v1675_v20 = vmul.f32 -1.442695, %v1581_v17  ;;  %v1477_v21 = vsel %vm1476_vm11, %v1473_v16, -inf }
 0x5fe   :  { %1478 = vmax.xlane.f32.xlu0 %v1477_v21 }
 0x5ff   :  { %2243 = vpow2.f32 %v1675_v20 }
 0x609   :  { %v2244_v22 = vpop.eup %2243 }
 0x60a   :  { %v1587_v23 = vadd.f32 1.0, %v2244_v22 }
 0x60c   :  { %2245 = vrcp.f32 %v1587_v23 }
 0x616   :  { %v2246_v24 = vpop.eup %2245 }
 0x617   :  { %1591 = vst.msk [vmem:[%s3243_s18] sm:$0xff] %vm1590_vm12, %v2246_v24  ;;  %s2383_s18 = scalar_lea.vmem %s1599_s9, 128 }
 0x618   :  { %p2384_p10 = scmp.ne.s32.totalorder %s1599_s9, %s2383_s18  ;;  %p2389_p12 = scmp.lt.s32.totalorder %s2383_s18, %s2383_s18 }
 0x61a   :  { %p2390_p13 = por %p2389_p12, %p2388_p11 }
 0x61c   :  { %p2391_p0 = pnand %p2390_p13, %p2384_p10 }
 0x68b   :  { %v1479_v25 = vpop.xlane.xlu0 %1478 }
 0x68c   :  { %v1480_v26 = vsub.f32 %v1473_v16, %v1479_v25 }
 0x68e   :  { %v1481_v27 = vmul.f32 1.442695, %v1480_v26 }
 0x690   :  { %2247 = vpow2.f32 %v1481_v27 }
 0x69a   :  { %v2248_v28 = vpop.eup %2247 }
 0x69b   :  { %v1483_v29 = vsel %vm1476_vm11, %v2248_v28, 0.0 }
 0x69c   :  { %1484 = vadd.xlane.f32.xlu1 %v1483_v29 }
 0x729   :  { %v1485_v30 = vpop.xlane.xlu1 %1484 }
 0x72a   :  { %2249 = vlog2.f32 %v1485_v30 }
 0x734   :  { %v2250_v31 = vpop.eup %2249 }
 0x735   :  { %v1487_v32 = vmul.f32 0.6931472, %v2250_v31 }
 0x737   :  { %v1488_v33 = vadd.f32 %v1487_v32, %v1479_v25 }
 0x739   :  { %v1489_v34 = vsub.f32 %v1473_v16, %v1488_v33 }
 0x73b   :  { %1490 = vst.msk [vmem:[#allocation17] sm:$0xff] %vm1476_vm11, %v1489_v34 }
 0x73c   :  { %2394 = shalt.err (!%p2391_p0)
}
 0x73d   :  { %s2395_s26 = scalar_lea.hbm %s3242_s17, 128 }
 0x73e   :  { %p2396_p1 = scmp.ne.s32.totalorder %s3242_s17, %s2395_s26  ;;  %p2399_p2 = scmp.lt.u32.totalorder %s2395_s26, %s3242_s17 }
 0x740   :  { %p2401_p3 = pnand %p2399_p2, %p2396_p1 }
 0x742   :  { %2404 = shalt.err (!%p2401_p3)
}
 0x743   :  { %1601 = dma.vmem_to_hbm [thread:$0]  %s1599_s9, 128, %s3242_s17, [#allocation8]  }
 0x744   :  { %2441 = dma.done.wait [#allocation8], 128  }
 0x745   :  { %2442 = vsyncadd [#allocation8], 4294967168 }
 0x746   :  { %1609 = vsyncpa [#allocation7], 1 }
 0x747   :  { %1610 = vsyncpa [#allocation10], 1 }
 0x748   :  { %1611 = vsyncpa [#allocation13], 1 }
 0x749   :  { %1612 = vsyncpa [#allocation16], 1 }
 0x74a   :  { %1613 = vsyncpa [#allocation8], 1 }

</bundles_post_ra>
